<compile_context>
chip_gen: v7x
topology: tpu7x:2x2x1
jax: 0.10.0
libtpu: 0.0.40
codegen_flags: <defaults>
</compile_context>

<pallas_src>
import math

import jax
import jax.numpy as jnp
from jax.experimental import pallas as pl
from jax.experimental.pallas import tpu as pltpu

# ----- hyperparameters (consistent with TranADModule(feats, lr, window)) -----
FEATS = 4
WINDOW = 8
BATCH = 2
D_MODEL = 2 * FEATS            # 8
NHEAD = FEATS                  # 4
HEAD_DIM = D_MODEL // NHEAD    # 2
DIM_FF = 16
BW = BATCH * WINDOW            # 16  (batch folded onto the sublane axis)
SQRT_F = math.sqrt(FEATS)
PACK_W = 3 * D_MODEL           # 24: lane width of the packed parameter slab

N_PARAMS = 35  # pe + enc(8) + dec1(12) + dec2(12) + fcn(2)


# ----------------------------- raw parameter init (deterministic, synthetic) -----------------------------
def init_params(key):
    keys = iter(jax.random.split(key, 64))

    def nrm(shape, scale=0.1):
        return scale * jax.random.normal(next(keys), shape, jnp.float32)

    def attn():
        return [nrm((3 * D_MODEL, D_MODEL)), nrm((1, 3 * D_MODEL)),
                nrm((D_MODEL, D_MODEL)), nrm((1, D_MODEL))]

    def ffn():
        return [nrm((DIM_FF, D_MODEL)), nrm((1, DIM_FF)),
                nrm((D_MODEL, DIM_FF)), nrm((1, D_MODEL))]

    # PositionalEncoding buffer: pe[p, i] = sin(p*dt[i]) + cos(p*dt[i]),
    # dt[i] = exp(-i * ln(1e4) / d_model)  (arange(0, d_model), as in the module)
    pos = jnp.arange(WINDOW, dtype=jnp.float32)[:, None]
    div = jnp.exp(jnp.arange(D_MODEL, dtype=jnp.float32) * (-math.log(10000.0) / D_MODEL))
    pe = jnp.sin(pos * div) + jnp.cos(pos * div)

    params = [pe]
    params += attn() + ffn()                       # transformer_encoder (1 layer)
    params += attn() + attn() + ffn()              # transformer_decoder1 (1 layer)
    params += attn() + attn() + ffn()              # transformer_decoder2 (1 layer)
    params += [nrm((FEATS, D_MODEL)), nrm((1, FEATS))]  # fcn: Linear(2*feats, feats) + Sigmoid
    assert len(params) == N_PARAMS
    return params


# ----------------------------- host-side preprocessing + packing -----------------------------
def pack_params(params):
    """Preprocess (fuse QKV / collapse FFNs / fold scales / broadcast biases /
    bake attention constants) and pack everything into a single
    (rows, PACK_W) f32 slab with 8-row-aligned blocks.
    Returns (packed_array, offsets) where offsets[name] = (row, rows, cols)."""
    pe = params[0]
    enc = params[1:9]
    dec1 = params[9:21]
    dec2 = params[21:33]
    fcn_w, fcn_b = params[33], params[34]

    E = D_MODEL
    scale = 1.0 / math.sqrt(HEAD_DIM)

    entries = []

    def add(name, arr):
        entries.append((name, jnp.asarray(arr, jnp.float32)))

    def bcast(row):  # (1, C) -> (BW, C): pre-broadcast biases, no in-kernel broadcast
        row = jnp.reshape(row, (1, -1))
        return jnp.broadcast_to(row, (BW, row.shape[1]))

    def add_self_attn(prefix, wi, bi, wo, bo):
        # fused QKV: [Wq^T * scale | Wk^T | Wv^T]  -> one (E, 3E) weight
        wq = wi[:E].T * scale
        wk = wi[E:2 * E].T
        wv = wi[2 * E:].T
        bq = bi[:, :E] * scale
        bk = bi[:, E:2 * E]
        bv = bi[:, 2 * E:]
        add(prefix + "_wqkv", jnp.concatenate([wq, wk, wv], axis=1))
        add(prefix + "_bqkv", bcast(jnp.concatenate([bq, bk, bv], axis=1)))
        add(prefix + "_wo", wo.T)
        add(prefix + "_bo", bcast(bo))

    def add_cross_attn(prefix, wi, bi, wo, bo):
        # q comes from tgt, k/v from memory -> fuse only K|V
        add(prefix + "_wq", wi[:E].T * scale)
        add(prefix + "_bq", bcast(bi[:, :E] * scale))
        add(prefix + "_wkv", jnp.concatenate([wi[E:2 * E].T, wi[2 * E:].T], axis=1))
        add(prefix + "_bkv", bcast(bi[:, E:]))
        add(prefix + "_wo", wo.T)
        add(prefix + "_bo", bcast(bo))

    def add_ffn(prefix, w1, b1, w2, b2):
        # LeakyReLU(True) -> negative_slope=1.0 -> identity activation,
        # so linear2(linear1(x)) collapses into one (E, E) linear.
        w = w1.T @ w2.T                 # (E, DIM_FF) @ (DIM_FF, E) -> (E, E)
        b = b1 @ w2.T + b2              # (1, E)
        add(prefix + "_w", w)
        add(prefix + "_b", bcast(b))

    # positional encoding, batch-tiled to (BW, E)
    add("pe", jnp.tile(pe, (BATCH, 1)))

    # stacked per-head lane masks: rows h*BW:(h+1)*BW select lanes of head h
    hm_rows = []
    for h in range(NHEAD):
        m = (jnp.arange(D_MODEL) // HEAD_DIM == h).astype(jnp.float32)
        hm_rows.append(jnp.broadcast_to(m[None, :], (BW, D_MODEL)))
    add("hmask", jnp.concatenate(hm_rows, axis=0))                 # (NHEAD*BW, E)

    # additive bias that blocks cross-batch attention in the (head,batch)-stacked scores
    ri = jnp.arange(NHEAD * BW)[:, None]
    ci = jnp.arange(BW)[None, :]
    abias = jnp.where((ri // WINDOW) % BATCH == ci // WINDOW, 0.0, -1e30)
    add("abias", abias.astype(jnp.float32))                        # (NHEAD*BW, BW)

    add_self_attn("enc_sa", *enc[0:4])
    add_ffn("enc_ff", *enc[4:8])
    add_self_attn("dec1_sa", *dec1[0:4])
    add_cross_attn("dec1_ca", *dec1[4:8])
    add_ffn("dec1_ff", *dec1[8:12])
    add_self_attn("dec2_sa", *dec2[0:4])
    add_cross_attn("dec2_ca", *dec2[4:8])
    add_ffn("dec2_ff", *dec2[8:12])
    add("fcn_w", fcn_w.T)
    add("fcn_b", bcast(fcn_b))

    offsets = {}
    blocks = []
    row = 0
    for name, arr in entries:
        r, c = arr.shape
        assert c <= PACK_W
        rp = -(-r // 8) * 8                            # pad rows to multiple of 8
        block = jnp.zeros((rp, PACK_W), jnp.float32).at[:r, :c].set(arr)
        blocks.append(block)
        offsets[name] = (row, r, c)
        row += rp
    packed = jnp.concatenate(blocks, axis=0)
    return packed, offsets


# ----------------------------- Pallas kernel -----------------------------
def _make_kernel(offsets):
    def kernel(in_ref, p_ref, out_ref):
        f32 = jnp.float32
        E = D_MODEL

        def get(name):
            off, r, c = offsets[name]                  # static python ints -> static slice
            return p_ref[off:off + r, :c]

        # ---- slab constants (built host-side, loaded once per invocation) ----
        pe = get("pe")                                 # (BW, E)
        hmask = get("hmask")                           # (NHEAD*BW, E)
        abias = get("abias")                           # (NHEAD*BW, BW)

        def softmax_rows(s):
            m = jnp.max(s, axis=-1, keepdims=True)
            e = jnp.exp(s - m)
            return e * pl.reciprocal(jnp.sum(e, axis=-1, keepdims=True), approx=True)

        def attn_core(qp, kp, vp, prefix):
            # stack heads (x batch) along the sublane axis: (NHEAD*BW, E) = (64, 8)
            qstack = jnp.concatenate([qp] * NHEAD, axis=0) * hmask
            s = jnp.dot(qstack, kp.T, preferred_element_type=f32) + abias   # (64, BW)
            p = softmax_rows(s)
            o = jnp.dot(p, vp, preferred_element_type=f32) * hmask          # (64, E)
            out = o[0:BW]
            for h in range(1, NHEAD):
                out = out + o[h * BW:(h + 1) * BW]
            return jnp.dot(out, get(prefix + "_wo"), preferred_element_type=f32) + get(prefix + "_bo")

        def self_attn(x, prefix):
            # single fused QKV projection (scale pre-folded into the Q columns)
            qkv = jnp.dot(x, get(prefix + "_wqkv"), preferred_element_type=f32) + get(prefix + "_bqkv")
            return attn_core(qkv[:, :E], qkv[:, E:2 * E], qkv[:, 2 * E:3 * E], prefix)

        def cross_attn(q_in, kv_in, prefix):
            qp = jnp.dot(q_in, get(prefix + "_wq"), preferred_element_type=f32) + get(prefix + "_bq")
            kv = jnp.dot(kv_in, get(prefix + "_wkv"), preferred_element_type=f32) + get(prefix + "_bkv")
            return attn_core(qp, kv[:, :E], kv[:, E:], prefix)

        def ffn(x, prefix):
            # linear1 -> LeakyReLU(slope=1.0, identity) -> linear2, collapsed host-side
            return jnp.dot(x, get(prefix + "_w"), preferred_element_type=f32) + get(prefix + "_b")

        def encoder_layer(x):
            x = x + self_attn(x, "enc_sa")
            return x + ffn(x, "enc_ff")

        def decoder_layer(t, mem, which):
            t = t + self_attn(t, which + "_sa")
            t = t + cross_attn(t, mem, which + "_ca")
            return t + ffn(t, which + "_ff")

        def fcn(x):
            z = jnp.dot(x, get("fcn_w"), preferred_element_type=f32) + get("fcn_b")
            return 1.0 / (1.0 + jnp.exp(-z))           # exact sigmoid (error feeds phase 2)

        # ---- merged (BW, 2F) input slab: [src | tgt] ----
        src = in_ref[:, :FEATS]                        # (BW, F)
        tgt = in_ref[:, FEATS:2 * FEATS]
        tgt2 = jnp.concatenate([tgt, tgt], axis=-1)    # tgt.repeat(1,1,2); same both phases

        def encode(c):
            s = jnp.concatenate([src, c], axis=-1) * SQRT_F + pe   # PositionalEncoding (dropout=identity)
            return encoder_layer(s)

        mem = encode(jnp.zeros_like(src))
        x1 = fcn(decoder_layer(tgt2, mem, "dec1"))
        mem = encode((x1 - src) ** 2)
        x2 = fcn(decoder_layer(tgt2, mem, "dec2"))

        out_ref[...] = jnp.concatenate([x1, x2], axis=-1)  # single merged (BW, 2F) store

    return kernel


def tranad_forward(src, tgt, packed, offsets):
    B, W, F = src.shape
    # one merged input DMA: [src | tgt] along lanes
    x = jnp.concatenate([src.reshape(B * W, F), tgt.reshape(B * W, F)], axis=-1)
    out = pl.pallas_call(
        _make_kernel(offsets),
        grid=(1,),
        in_specs=[
            pl.BlockSpec((B * W, 2 * F), lambda i: (0, 0)),
            pl.BlockSpec(packed.shape, lambda i: (0, 0)),
        ],
        out_specs=pl.BlockSpec((B * W, 2 * F), lambda i: (0, 0)),
        out_shape=jax.ShapeDtypeStruct((B * W, 2 * F), jnp.float32),
        compiler_params=pltpu.CompilerParams(dimension_semantics=("arbitrary",)),
    )(x, packed)
    x1 = out[:, :F].reshape(B, W, F)
    x2 = out[:, F:].reshape(B, W, F)
    return x1, x2


# ----------------------------- pure-JAX reference (raw params, exact math) -----------------------------
def _ref_softmax(x):
    m = jnp.max(x, axis=-1, keepdims=True)
    e = jnp.exp(x - m)
    return e / jnp.sum(e, axis=-1, keepdims=True)


def _ref_mha(q_in, k_in, v_in, wi, bi, wo, bo):
    E = D_MODEL
    qp = jnp.dot(q_in, wi[:E].T) + bi[:, :E]
    kp = jnp.dot(k_in, wi[E:2 * E].T) + bi[:, E:2 * E]
    vp = jnp.dot(v_in, wi[2 * E:].T) + bi[:, 2 * E:]
    scale = 1.0 / math.sqrt(HEAD_DIM)
    col = jax.lax.broadcasted_iota(jnp.int32, (1, E), 1)
    out = jnp.zeros_like(qp)
    for h in range(NHEAD):
        m = (col // HEAD_DIM == h).astype(jnp.float32)
        s = jnp.dot(qp * m * scale, kp.T)
        p = _ref_softmax(s)
        out = out + jnp.dot(p, vp * m)
    return jnp.dot(out, wo.T) + bo


def _ref_ffn(x, w1, b1, w2, b2):
    h = jnp.dot(x, w1.T) + b1
    # LeakyReLU(True) -> negative_slope=1.0 -> identity
    return jnp.dot(h, w2.T) + b2


def _ref_forward_single(src, tgt, params):
    pe = params[0]
    enc = params[1:9]
    dec1 = params[9:21]
    dec2 = params[21:33]
    fcn_w, fcn_b = params[33], params[34]

    def enc_layer(x, p):
        wi, bi, wo, bo, w1, b1, w2, b2 = p
        x = x + _ref_mha(x, x, x, wi, bi, wo, bo)
        return x + _ref_ffn(x, w1, b1, w2, b2)

    def dec_layer(t, mem, p):
        wi1, bi1, wo1, bo1, wi2, bi2, wo2, bo2, w1, b1, w2, b2 = p
        t = t + _ref_mha(t, t, t, wi1, bi1, wo1, bo1)
        t = t + _ref_mha(t, mem, mem, wi2, bi2, wo2, bo2)
        return t + _ref_ffn(t, w1, b1, w2, b2)

    def fcn(x):
        z = jnp.dot(x, fcn_w.T) + fcn_b
        return 1.0 / (1.0 + jnp.exp(-z))

    def encode(c):
        s = jnp.concatenate([src, c], axis=-1) * SQRT_F + pe
        mem = enc_layer(s, enc)
        t = jnp.concatenate([tgt, tgt], axis=-1)
        return t, mem

    t, mem = encode(jnp.zeros_like(src))
    x1 = fcn(dec_layer(t, mem, dec1))
    t, mem = encode((x1 - src) ** 2)
    x2 = fcn(dec_layer(t, mem, dec2))
    return x1, x2


def tranad_reference(src, tgt, params):
    return jax.vmap(lambda s, t: _ref_forward_single(s, t, params))(src, tgt)


if __name__ == "__main__":
    key = jax.random.PRNGKey(0)
    kp, ks, kt = jax.random.split(key, 3)
    raw_params = init_params(kp)
    packed, offsets = pack_params(raw_params)
    src = jax.random.normal(ks, (BATCH, WINDOW, FEATS), jnp.float32)
    tgt = jax.random.normal(kt, (BATCH, WINDOW, FEATS), jnp.float32)

    x1, x2 = tranad_forward(src, tgt, packed, offsets)
    jax.block_until_ready((x1, x2))

    r1, r2 = tranad_reference(src, tgt, raw_params)
    assert x1.shape == (BATCH, WINDOW, FEATS) and x2.shape == (BATCH, WINDOW, FEATS)
    assert jnp.allclose(x1, r1, atol=2e-2, rtol=2e-2)
    assert jnp.allclose(x2, r2, atol=2e-2, rtol=2e-2)
    print("KERNEL_OK")
</pallas_src>

<mosaic_0001>
module attributes {stable_mosaic.version = 11 : i64} {
  func.func @kernel(%arg0: i32, %arg1: memref<16x8xf32, #tpu.memory_space<vmem>>, %arg2: memref<528x24xf32, #tpu.memory_space<vmem>>, %arg3: memref<16x8xf32, #tpu.memory_space<vmem>>) attributes {dimension_semantics = [#tpu.dimension_semantics<arbitrary>], iteration_bounds = array<i64: 1>, scalar_prefetch = 0 : i64, scratch_operands = 0 : i64, tpu.core_type = #tpu.core_type<tc>, window_params = [{pipeline_mode = #tpu.pipeline_mode<synchronous>, transform_indices = @transform_0, window_bounds = array<i64: 16, 8>}, {pipeline_mode = #tpu.pipeline_mode<synchronous>, transform_indices = @transform_1, window_bounds = array<i64: 528, 24>}, {pipeline_mode = #tpu.pipeline_mode<synchronous>, transform_indices = @transform_2, window_bounds = array<i64: 16, 8>}]} {
    %c0 = arith.constant 0 : index
    %c0_0 = arith.constant 0 : index
    %0 = vector.load %arg2[%c0, %c0_0] : memref<528x24xf32, #tpu.memory_space<vmem>>, vector<16x8xf32>
    %c16 = arith.constant 16 : index
    %c0_1 = arith.constant 0 : index
    %1 = vector.load %arg2[%c16, %c0_1] : memref<528x24xf32, #tpu.memory_space<vmem>>, vector<64x8xf32>
    %c80 = arith.constant 80 : index
    %c0_2 = arith.constant 0 : index
    %2 = vector.load %arg2[%c80, %c0_2] : memref<528x24xf32, #tpu.memory_space<vmem>>, vector<64x16xf32>
    %c0_3 = arith.constant 0 : index
    %c0_4 = arith.constant 0 : index
    %3 = vector.load %arg1[%c0_3, %c0_4] : memref<16x8xf32, #tpu.memory_space<vmem>>, vector<16x4xf32>
    %c0_5 = arith.constant 0 : index
    %c4 = arith.constant 4 : index
    %4 = vector.load %arg1[%c0_5, %c4] : memref<16x8xf32, #tpu.memory_space<vmem>>, vector<16x4xf32>
    %5 = tpu.concatenate %4, %4 in 1 : vector<16x4xf32>, vector<16x4xf32> -> vector<16x8xf32>
    %cst = arith.constant 0.000000e+00 : f32
    %6 = vector.broadcast %cst : f32 to vector<16x4xf32>
    %7 = tpu.concatenate %3, %6 in 1 : vector<16x4xf32>, vector<16x4xf32> -> vector<16x8xf32>
    %cst_6 = arith.constant 2.000000e+00 : f32
    %8 = vector.broadcast %cst_6 : f32 to vector<16x8xf32>
    %9 = arith.mulf %7, %8 : vector<16x8xf32>
    %10 = arith.addf %9, %0 : vector<16x8xf32>
    %c144 = arith.constant 144 : index
    %c0_7 = arith.constant 0 : index
    %11 = vector.load %arg2[%c144, %c0_7] : memref<528x24xf32, #tpu.memory_space<vmem>>, vector<8x24xf32>
    %cst_8 = arith.constant dense<0.000000e+00> : vector<16x24xf32>
    %12 = tpu.matmul %10, %11, %cst_8 {dimension_numbers = #tpu.dot_dimension_numbers<[1], [0], [0], [1], [0, 0, 1, 1], [], []>} : vector<16x8xf32>, vector<8x24xf32>, vector<16x24xf32> -> vector<16x24xf32>
    %c152 = arith.constant 152 : index
    %c0_9 = arith.constant 0 : index
    %13 = vector.load %arg2[%c152, %c0_9] : memref<528x24xf32, #tpu.memory_space<vmem>>, vector<16x24xf32>
    %14 = arith.addf %12, %13 : vector<16x24xf32>
    %15 = vector.extract_strided_slice %14 {offsets = [0, 0], sizes = [16, 8], strides = [1, 1]} : vector<16x24xf32> to vector<16x8xf32>
    %16 = vector.extract_strided_slice %14 {offsets = [0, 8], sizes = [16, 8], strides = [1, 1]} : vector<16x24xf32> to vector<16x8xf32>
    %17 = vector.extract_strided_slice %14 {offsets = [0, 16], sizes = [16, 8], strides = [1, 1]} : vector<16x24xf32> to vector<16x8xf32>
    %18 = tpu.concatenate %15, %15, %15, %15 in 0 : vector<16x8xf32>, vector<16x8xf32>, vector<16x8xf32>, vector<16x8xf32> -> vector<64x8xf32>
    %19 = arith.mulf %18, %1 : vector<64x8xf32>
    %20 = tpu.transpose %16, [1, 0] : vector<16x8xf32> -> vector<8x16xf32>
    %cst_10 = arith.constant dense<0.000000e+00> : vector<64x16xf32>
    %21 = tpu.matmul %19, %20, %cst_10 {dimension_numbers = #tpu.dot_dimension_numbers<[1], [0], [0], [1], [0, 0, 1, 1], [], []>} : vector<64x8xf32>, vector<8x16xf32>, vector<64x16xf32> -> vector<64x16xf32>
    %22 = arith.addf %21, %2 : vector<64x16xf32>
    %cst_11 = arith.constant dense<0xFF800000> : vector<64xf32>
    %23 = vector.multi_reduction <maximumf>, %22, %cst_11 [1] : vector<64x16xf32> to vector<64xf32>
    %24 = vector.shape_cast %23 : vector<64xf32> to vector<64x1xf32>
    %25 = vector.broadcast %24 : vector<64x1xf32> to vector<64x16xf32>
    %26 = arith.subf %22, %25 : vector<64x16xf32>
    %27 = math.exp %26 : vector<64x16xf32>
    %cst_12 = arith.constant dense<0.000000e+00> : vector<64xf32>
    %28 = vector.multi_reduction <add>, %27, %cst_12 [1] : vector<64x16xf32> to vector<64xf32>
    %29 = vector.shape_cast %28 : vector<64xf32> to vector<64x1xf32>
    %30 = tpu.reciprocal %29 {approx = true} : vector<64x1xf32> -> vector<64x1xf32>
    %31 = vector.broadcast %30 : vector<64x1xf32> to vector<64x16xf32>
    %32 = arith.mulf %27, %31 : vector<64x16xf32>
    %cst_13 = arith.constant dense<0.000000e+00> : vector<64x8xf32>
    %33 = tpu.matmul %32, %17, %cst_13 {dimension_numbers = #tpu.dot_dimension_numbers<[1], [0], [0], [1], [0, 0, 1, 1], [], []>} : vector<64x16xf32>, vector<16x8xf32>, vector<64x8xf32> -> vector<64x8xf32>
    %34 = arith.mulf %33, %1 : vector<64x8xf32>
    %35 = vector.extract_strided_slice %34 {offsets = [0, 0], sizes = [16, 8], strides = [1, 1]} : vector<64x8xf32> to vector<16x8xf32>
    %36 = vector.extract_strided_slice %34 {offsets = [16, 0], sizes = [16, 8], strides = [1, 1]} : vector<64x8xf32> to vector<16x8xf32>
    %37 = arith.addf %35, %36 : vector<16x8xf32>
    %38 = vector.extract_strided_slice %34 {offsets = [32, 0], sizes = [16, 8], strides = [1, 1]} : vector<64x8xf32> to vector<16x8xf32>
    %39 = arith.addf %37, %38 : vector<16x8xf32>
    %40 = vector.extract_strided_slice %34 {offsets = [48, 0], sizes = [16, 8], strides = [1, 1]} : vector<64x8xf32> to vector<16x8xf32>
    %41 = arith.addf %39, %40 : vector<16x8xf32>
    %c168 = arith.constant 168 : index
    %c0_14 = arith.constant 0 : index
    %42 = vector.load %arg2[%c168, %c0_14] : memref<528x24xf32, #tpu.memory_space<vmem>>, vector<8x8xf32>
    %cst_15 = arith.constant dense<0.000000e+00> : vector<16x8xf32>
    %43 = tpu.matmul %41, %42, %cst_15 {dimension_numbers = #tpu.dot_dimension_numbers<[1], [0], [0], [1], [0, 0, 1, 1], [], []>} : vector<16x8xf32>, vector<8x8xf32>, vector<16x8xf32> -> vector<16x8xf32>
    %c176 = arith.constant 176 : index
    %c0_16 = arith.constant 0 : index
    %44 = vector.load %arg2[%c176, %c0_16] : memref<528x24xf32, #tpu.memory_space<vmem>>, vector<16x8xf32>
    %45 = arith.addf %43, %44 : vector<16x8xf32>
    %46 = arith.addf %10, %45 : vector<16x8xf32>
    %c192 = arith.constant 192 : index
    %c0_17 = arith.constant 0 : index
    %47 = vector.load %arg2[%c192, %c0_17] : memref<528x24xf32, #tpu.memory_space<vmem>>, vector<8x8xf32>
    %cst_18 = arith.constant dense<0.000000e+00> : vector<16x8xf32>
    %48 = tpu.matmul %46, %47, %cst_18 {dimension_numbers = #tpu.dot_dimension_numbers<[1], [0], [0], [1], [0, 0, 1, 1], [], []>} : vector<16x8xf32>, vector<8x8xf32>, vector<16x8xf32> -> vector<16x8xf32>
    %c200 = arith.constant 200 : index
    %c0_19 = arith.constant 0 : index
    %49 = vector.load %arg2[%c200, %c0_19] : memref<528x24xf32, #tpu.memory_space<vmem>>, vector<16x8xf32>
    %50 = arith.addf %48, %49 : vector<16x8xf32>
    %51 = arith.addf %46, %50 : vector<16x8xf32>
    %c216 = arith.constant 216 : index
    %c0_20 = arith.constant 0 : index
    %52 = vector.load %arg2[%c216, %c0_20] : memref<528x24xf32, #tpu.memory_space<vmem>>, vector<8x24xf32>
    %cst_21 = arith.constant dense<0.000000e+00> : vector<16x24xf32>
    %53 = tpu.matmul %5, %52, %cst_21 {dimension_numbers = #tpu.dot_dimension_numbers<[1], [0], [0], [1], [0, 0, 1, 1], [], []>} : vector<16x8xf32>, vector<8x24xf32>, vector<16x24xf32> -> vector<16x24xf32>
    %c224 = arith.constant 224 : index
    %c0_22 = arith.constant 0 : index
    %54 = vector.load %arg2[%c224, %c0_22] : memref<528x24xf32, #tpu.memory_space<vmem>>, vector<16x24xf32>
    %55 = arith.addf %53, %54 : vector<16x24xf32>
    %56 = vector.extract_strided_slice %55 {offsets = [0, 0], sizes = [16, 8], strides = [1, 1]} : vector<16x24xf32> to vector<16x8xf32>
    %57 = vector.extract_strided_slice %55 {offsets = [0, 8], sizes = [16, 8], strides = [1, 1]} : vector<16x24xf32> to vector<16x8xf32>
    %58 = vector.extract_strided_slice %55 {offsets = [0, 16], sizes = [16, 8], strides = [1, 1]} : vector<16x24xf32> to vector<16x8xf32>
    %59 = tpu.concatenate %56, %56, %56, %56 in 0 : vector<16x8xf32>, vector<16x8xf32>, vector<16x8xf32>, vector<16x8xf32> -> vector<64x8xf32>
    %60 = arith.mulf %59, %1 : vector<64x8xf32>
    %61 = tpu.transpose %57, [1, 0] : vector<16x8xf32> -> vector<8x16xf32>
    %cst_23 = arith.constant dense<0.000000e+00> : vector<64x16xf32>
    %62 = tpu.matmul %60, %61, %cst_23 {dimension_numbers = #tpu.dot_dimension_numbers<[1], [0], [0], [1], [0, 0, 1, 1], [], []>} : vector<64x8xf32>, vector<8x16xf32>, vector<64x16xf32> -> vector<64x16xf32>
    %63 = arith.addf %62, %2 : vector<64x16xf32>
    %cst_24 = arith.constant dense<0xFF800000> : vector<64xf32>
    %64 = vector.multi_reduction <maximumf>, %63, %cst_24 [1] : vector<64x16xf32> to vector<64xf32>
    %65 = vector.shape_cast %64 : vector<64xf32> to vector<64x1xf32>
    %66 = vector.broadcast %65 : vector<64x1xf32> to vector<64x16xf32>
    %67 = arith.subf %63, %66 : vector<64x16xf32>
    %68 = math.exp %67 : vector<64x16xf32>
    %cst_25 = arith.constant dense<0.000000e+00> : vector<64xf32>
    %69 = vector.multi_reduction <add>, %68, %cst_25 [1] : vector<64x16xf32> to vector<64xf32>
    %70 = vector.shape_cast %69 : vector<64xf32> to vector<64x1xf32>
    %71 = tpu.reciprocal %70 {approx = true} : vector<64x1xf32> -> vector<64x1xf32>
    %72 = vector.broadcast %71 : vector<64x1xf32> to vector<64x16xf32>
    %73 = arith.mulf %68, %72 : vector<64x16xf32>
    %cst_26 = arith.constant dense<0.000000e+00> : vector<64x8xf32>
    %74 = tpu.matmul %73, %58, %cst_26 {dimension_numbers = #tpu.dot_dimension_numbers<[1], [0], [0], [1], [0, 0, 1, 1], [], []>} : vector<64x16xf32>, vector<16x8xf32>, vector<64x8xf32> -> vector<64x8xf32>
    %75 = arith.mulf %74, %1 : vector<64x8xf32>
    %76 = vector.extract_strided_slice %75 {offsets = [0, 0], sizes = [16, 8], strides = [1, 1]} : vector<64x8xf32> to vector<16x8xf32>
    %77 = vector.extract_strided_slice %75 {offsets = [16, 0], sizes = [16, 8], strides = [1, 1]} : vector<64x8xf32> to vector<16x8xf32>
    %78 = arith.addf %76, %77 : vector<16x8xf32>
    %79 = vector.extract_strided_slice %75 {offsets = [32, 0], sizes = [16, 8], strides = [1, 1]} : vector<64x8xf32> to vector<16x8xf32>
    %80 = arith.addf %78, %79 : vector<16x8xf32>
    %81 = vector.extract_strided_slice %75 {offsets = [48, 0], sizes = [16, 8], strides = [1, 1]} : vector<64x8xf32> to vector<16x8xf32>
    %82 = arith.addf %80, %81 : vector<16x8xf32>
    %c240 = arith.constant 240 : index
    %c0_27 = arith.constant 0 : index
    %83 = vector.load %arg2[%c240, %c0_27] : memref<528x24xf32, #tpu.memory_space<vmem>>, vector<8x8xf32>
    %cst_28 = arith.constant dense<0.000000e+00> : vector<16x8xf32>
    %84 = tpu.matmul %82, %83, %cst_28 {dimension_numbers = #tpu.dot_dimension_numbers<[1], [0], [0], [1], [0, 0, 1, 1], [], []>} : vector<16x8xf32>, vector<8x8xf32>, vector<16x8xf32> -> vector<16x8xf32>
    %c248 = arith.constant 248 : index
    %c0_29 = arith.constant 0 : index
    %85 = vector.load %arg2[%c248, %c0_29] : memref<528x24xf32, #tpu.memory_space<vmem>>, vector<16x8xf32>
    %86 = arith.addf %84, %85 : vector<16x8xf32>
    %87 = arith.addf %5, %86 : vector<16x8xf32>
    %c264 = arith.constant 264 : index
    %c0_30 = arith.constant 0 : index
    %88 = vector.load %arg2[%c264, %c0_30] : memref<528x24xf32, #tpu.memory_space<vmem>>, vector<8x8xf32>
    %cst_31 = arith.constant dense<0.000000e+00> : vector<16x8xf32>
    %89 = tpu.matmul %87, %88, %cst_31 {dimension_numbers = #tpu.dot_dimension_numbers<[1], [0], [0], [1], [0, 0, 1, 1], [], []>} : vector<16x8xf32>, vector<8x8xf32>, vector<16x8xf32> -> vector<16x8xf32>
    %c272 = arith.constant 272 : index
    %c0_32 = arith.constant 0 : index
    %90 = vector.load %arg2[%c272, %c0_32] : memref<528x24xf32, #tpu.memory_space<vmem>>, vector<16x8xf32>
    %91 = arith.addf %89, %90 : vector<16x8xf32>
    %c288 = arith.constant 288 : index
    %c0_33 = arith.constant 0 : index
    %92 = vector.load %arg2[%c288, %c0_33] : memref<528x24xf32, #tpu.memory_space<vmem>>, vector<8x16xf32>
    %cst_34 = arith.constant dense<0.000000e+00> : vector<16x16xf32>
    %93 = tpu.matmul %51, %92, %cst_34 {dimension_numbers = #tpu.dot_dimension_numbers<[1], [0], [0], [1], [0, 0, 1, 1], [], []>} : vector<16x8xf32>, vector<8x16xf32>, vector<16x16xf32> -> vector<16x16xf32>
    %c296 = arith.constant 296 : index
    %c0_35 = arith.constant 0 : index
    %94 = vector.load %arg2[%c296, %c0_35] : memref<528x24xf32, #tpu.memory_space<vmem>>, vector<16x16xf32>
    %95 = arith.addf %93, %94 : vector<16x16xf32>
    %96 = vector.extract_strided_slice %95 {offsets = [0, 0], sizes = [16, 8], strides = [1, 1]} : vector<16x16xf32> to vector<16x8xf32>
    %97 = vector.extract_strided_slice %95 {offsets = [0, 8], sizes = [16, 8], strides = [1, 1]} : vector<16x16xf32> to vector<16x8xf32>
    %98 = tpu.concatenate %91, %91, %91, %91 in 0 : vector<16x8xf32>, vector<16x8xf32>, vector<16x8xf32>, vector<16x8xf32> -> vector<64x8xf32>
    %99 = arith.mulf %98, %1 : vector<64x8xf32>
    %100 = tpu.transpose %96, [1, 0] : vector<16x8xf32> -> vector<8x16xf32>
    %cst_36 = arith.constant dense<0.000000e+00> : vector<64x16xf32>
    %101 = tpu.matmul %99, %100, %cst_36 {dimension_numbers = #tpu.dot_dimension_numbers<[1], [0], [0], [1], [0, 0, 1, 1], [], []>} : vector<64x8xf32>, vector<8x16xf32>, vector<64x16xf32> -> vector<64x16xf32>
    %102 = arith.addf %101, %2 : vector<64x16xf32>
    %cst_37 = arith.constant dense<0xFF800000> : vector<64xf32>
    %103 = vector.multi_reduction <maximumf>, %102, %cst_37 [1] : vector<64x16xf32> to vector<64xf32>
    %104 = vector.shape_cast %103 : vector<64xf32> to vector<64x1xf32>
    %105 = vector.broadcast %104 : vector<64x1xf32> to vector<64x16xf32>
    %106 = arith.subf %102, %105 : vector<64x16xf32>
    %107 = math.exp %106 : vector<64x16xf32>
    %cst_38 = arith.constant dense<0.000000e+00> : vector<64xf32>
    %108 = vector.multi_reduction <add>, %107, %cst_38 [1] : vector<64x16xf32> to vector<64xf32>
    %109 = vector.shape_cast %108 : vector<64xf32> to vector<64x1xf32>
    %110 = tpu.reciprocal %109 {approx = true} : vector<64x1xf32> -> vector<64x1xf32>
    %111 = vector.broadcast %110 : vector<64x1xf32> to vector<64x16xf32>
    %112 = arith.mulf %107, %111 : vector<64x16xf32>
    %cst_39 = arith.constant dense<0.000000e+00> : vector<64x8xf32>
    %113 = tpu.matmul %112, %97, %cst_39 {dimension_numbers = #tpu.dot_dimension_numbers<[1], [0], [0], [1], [0, 0, 1, 1], [], []>} : vector<64x16xf32>, vector<16x8xf32>, vector<64x8xf32> -> vector<64x8xf32>
    %114 = arith.mulf %113, %1 : vector<64x8xf32>
    %115 = vector.extract_strided_slice %114 {offsets = [0, 0], sizes = [16, 8], strides = [1, 1]} : vector<64x8xf32> to vector<16x8xf32>
    %116 = vector.extract_strided_slice %114 {offsets = [16, 0], sizes = [16, 8], strides = [1, 1]} : vector<64x8xf32> to vector<16x8xf32>
    %117 = arith.addf %115, %116 : vector<16x8xf32>
    %118 = vector.extract_strided_slice %114 {offsets = [32, 0], sizes = [16, 8], strides = [1, 1]} : vector<64x8xf32> to vector<16x8xf32>
    %119 = arith.addf %117, %118 : vector<16x8xf32>
    %120 = vector.extract_strided_slice %114 {offsets = [48, 0], sizes = [16, 8], strides = [1, 1]} : vector<64x8xf32> to vector<16x8xf32>
    %121 = arith.addf %119, %120 : vector<16x8xf32>
    %c312 = arith.constant 312 : index
    %c0_40 = arith.constant 0 : index
    %122 = vector.load %arg2[%c312, %c0_40] : memref<528x24xf32, #tpu.memory_space<vmem>>, vector<8x8xf32>
    %cst_41 = arith.constant dense<0.000000e+00> : vector<16x8xf32>
    %123 = tpu.matmul %121, %122, %cst_41 {dimension_numbers = #tpu.dot_dimension_numbers<[1], [0], [0], [1], [0, 0, 1, 1], [], []>} : vector<16x8xf32>, vector<8x8xf32>, vector<16x8xf32> -> vector<16x8xf32>
    %c320 = arith.constant 320 : index
    %c0_42 = arith.constant 0 : index
    %124 = vector.load %arg2[%c320, %c0_42] : memref<528x24xf32, #tpu.memory_space<vmem>>, vector<16x8xf32>
    %125 = arith.addf %123, %124 : vector<16x8xf32>
    %126 = arith.addf %87, %125 : vector<16x8xf32>
    %c336 = arith.constant 336 : index
    %c0_43 = arith.constant 0 : index
    %127 = vector.load %arg2[%c336, %c0_43] : memref<528x24xf32, #tpu.memory_space<vmem>>, vector<8x8xf32>
    %cst_44 = arith.constant dense<0.000000e+00> : vector<16x8xf32>
    %128 = tpu.matmul %126, %127, %cst_44 {dimension_numbers = #tpu.dot_dimension_numbers<[1], [0], [0], [1], [0, 0, 1, 1], [], []>} : vector<16x8xf32>, vector<8x8xf32>, vector<16x8xf32> -> vector<16x8xf32>
    %c344 = arith.constant 344 : index
    %c0_45 = arith.constant 0 : index
    %129 = vector.load %arg2[%c344, %c0_45] : memref<528x24xf32, #tpu.memory_space<vmem>>, vector<16x8xf32>
    %130 = arith.addf %128, %129 : vector<16x8xf32>
    %131 = arith.addf %126, %130 : vector<16x8xf32>
    %c504 = arith.constant 504 : index
    %c0_46 = arith.constant 0 : index
    %132 = vector.load %arg2[%c504, %c0_46] : memref<528x24xf32, #tpu.memory_space<vmem>>, vector<8x4xf32>
    %cst_47 = arith.constant dense<0.000000e+00> : vector<16x4xf32>
    %133 = tpu.matmul %131, %132, %cst_47 {dimension_numbers = #tpu.dot_dimension_numbers<[1], [0], [0], [1], [0, 0, 1, 1], [], []>} : vector<16x8xf32>, vector<8x4xf32>, vector<16x4xf32> -> vector<16x4xf32>
    %c512 = arith.constant 512 : index
    %c0_48 = arith.constant 0 : index
    %134 = vector.load %arg2[%c512, %c0_48] : memref<528x24xf32, #tpu.memory_space<vmem>>, vector<16x4xf32>
    %135 = arith.addf %133, %134 : vector<16x4xf32>
    %cst_49 = arith.constant 0.000000e+00 : f32
    %136 = vector.broadcast %cst_49 : f32 to vector<16x4xf32>
    %137 = arith.subf %136, %135 : vector<16x4xf32>
    %138 = math.exp %137 : vector<16x4xf32>
    %cst_50 = arith.constant 1.000000e+00 : f32
    %139 = vector.broadcast %cst_50 : f32 to vector<16x4xf32>
    %140 = arith.addf %139, %138 : vector<16x4xf32>
    %cst_51 = arith.constant 1.000000e+00 : f32
    %141 = vector.broadcast %cst_51 : f32 to vector<16x4xf32>
    %142 = arith.divf %141, %140 : vector<16x4xf32>
    %143 = arith.subf %142, %3 : vector<16x4xf32>
    %144 = arith.mulf %143, %143 : vector<16x4xf32>
    %145 = tpu.concatenate %3, %144 in 1 : vector<16x4xf32>, vector<16x4xf32> -> vector<16x8xf32>
    %cst_52 = arith.constant 2.000000e+00 : f32
    %146 = vector.broadcast %cst_52 : f32 to vector<16x8xf32>
    %147 = arith.mulf %145, %146 : vector<16x8xf32>
    %148 = arith.addf %147, %0 : vector<16x8xf32>
    %c144_53 = arith.constant 144 : index
    %c0_54 = arith.constant 0 : index
    %149 = vector.load %arg2[%c144_53, %c0_54] : memref<528x24xf32, #tpu.memory_space<vmem>>, vector<8x24xf32>
    %cst_55 = arith.constant dense<0.000000e+00> : vector<16x24xf32>
    %150 = tpu.matmul %148, %149, %cst_55 {dimension_numbers = #tpu.dot_dimension_numbers<[1], [0], [0], [1], [0, 0, 1, 1], [], []>} : vector<16x8xf32>, vector<8x24xf32>, vector<16x24xf32> -> vector<16x24xf32>
    %c152_56 = arith.constant 152 : index
    %c0_57 = arith.constant 0 : index
    %151 = vector.load %arg2[%c152_56, %c0_57] : memref<528x24xf32, #tpu.memory_space<vmem>>, vector<16x24xf32>
    %152 = arith.addf %150, %151 : vector<16x24xf32>
    %153 = vector.extract_strided_slice %152 {offsets = [0, 0], sizes = [16, 8], strides = [1, 1]} : vector<16x24xf32> to vector<16x8xf32>
    %154 = vector.extract_strided_slice %152 {offsets = [0, 8], sizes = [16, 8], strides = [1, 1]} : vector<16x24xf32> to vector<16x8xf32>
    %155 = vector.extract_strided_slice %152 {offsets = [0, 16], sizes = [16, 8], strides = [1, 1]} : vector<16x24xf32> to vector<16x8xf32>
    %156 = tpu.concatenate %153, %153, %153, %153 in 0 : vector<16x8xf32>, vector<16x8xf32>, vector<16x8xf32>, vector<16x8xf32> -> vector<64x8xf32>
    %157 = arith.mulf %156, %1 : vector<64x8xf32>
    %158 = tpu.transpose %154, [1, 0] : vector<16x8xf32> -> vector<8x16xf32>
    %cst_58 = arith.constant dense<0.000000e+00> : vector<64x16xf32>
    %159 = tpu.matmul %157, %158, %cst_58 {dimension_numbers = #tpu.dot_dimension_numbers<[1], [0], [0], [1], [0, 0, 1, 1], [], []>} : vector<64x8xf32>, vector<8x16xf32>, vector<64x16xf32> -> vector<64x16xf32>
    %160 = arith.addf %159, %2 : vector<64x16xf32>
    %cst_59 = arith.constant dense<0xFF800000> : vector<64xf32>
    %161 = vector.multi_reduction <maximumf>, %160, %cst_59 [1] : vector<64x16xf32> to vector<64xf32>
    %162 = vector.shape_cast %161 : vector<64xf32> to vector<64x1xf32>
    %163 = vector.broadcast %162 : vector<64x1xf32> to vector<64x16xf32>
    %164 = arith.subf %160, %163 : vector<64x16xf32>
    %165 = math.exp %164 : vector<64x16xf32>
    %cst_60 = arith.constant dense<0.000000e+00> : vector<64xf32>
    %166 = vector.multi_reduction <add>, %165, %cst_60 [1] : vector<64x16xf32> to vector<64xf32>
    %167 = vector.shape_cast %166 : vector<64xf32> to vector<64x1xf32>
    %168 = tpu.reciprocal %167 {approx = true} : vector<64x1xf32> -> vector<64x1xf32>
    %169 = vector.broadcast %168 : vector<64x1xf32> to vector<64x16xf32>
    %170 = arith.mulf %165, %169 : vector<64x16xf32>
    %cst_61 = arith.constant dense<0.000000e+00> : vector<64x8xf32>
    %171 = tpu.matmul %170, %155, %cst_61 {dimension_numbers = #tpu.dot_dimension_numbers<[1], [0], [0], [1], [0, 0, 1, 1], [], []>} : vector<64x16xf32>, vector<16x8xf32>, vector<64x8xf32> -> vector<64x8xf32>
    %172 = arith.mulf %171, %1 : vector<64x8xf32>
    %173 = vector.extract_strided_slice %172 {offsets = [0, 0], sizes = [16, 8], strides = [1, 1]} : vector<64x8xf32> to vector<16x8xf32>
    %174 = vector.extract_strided_slice %172 {offsets = [16, 0], sizes = [16, 8], strides = [1, 1]} : vector<64x8xf32> to vector<16x8xf32>
    %175 = arith.addf %173, %174 : vector<16x8xf32>
    %176 = vector.extract_strided_slice %172 {offsets = [32, 0], sizes = [16, 8], strides = [1, 1]} : vector<64x8xf32> to vector<16x8xf32>
    %177 = arith.addf %175, %176 : vector<16x8xf32>
    %178 = vector.extract_strided_slice %172 {offsets = [48, 0], sizes = [16, 8], strides = [1, 1]} : vector<64x8xf32> to vector<16x8xf32>
    %179 = arith.addf %177, %178 : vector<16x8xf32>
    %c168_62 = arith.constant 168 : index
    %c0_63 = arith.constant 0 : index
    %180 = vector.load %arg2[%c168_62, %c0_63] : memref<528x24xf32, #tpu.memory_space<vmem>>, vector<8x8xf32>
    %cst_64 = arith.constant dense<0.000000e+00> : vector<16x8xf32>
    %181 = tpu.matmul %179, %180, %cst_64 {dimension_numbers = #tpu.dot_dimension_numbers<[1], [0], [0], [1], [0, 0, 1, 1], [], []>} : vector<16x8xf32>, vector<8x8xf32>, vector<16x8xf32> -> vector<16x8xf32>
    %c176_65 = arith.constant 176 : index
    %c0_66 = arith.constant 0 : index
    %182 = vector.load %arg2[%c176_65, %c0_66] : memref<528x24xf32, #tpu.memory_space<vmem>>, vector<16x8xf32>
    %183 = arith.addf %181, %182 : vector<16x8xf32>
    %184 = arith.addf %148, %183 : vector<16x8xf32>
    %c192_67 = arith.constant 192 : index
    %c0_68 = arith.constant 0 : index
    %185 = vector.load %arg2[%c192_67, %c0_68] : memref<528x24xf32, #tpu.memory_space<vmem>>, vector<8x8xf32>
    %cst_69 = arith.constant dense<0.000000e+00> : vector<16x8xf32>
    %186 = tpu.matmul %184, %185, %cst_69 {dimension_numbers = #tpu.dot_dimension_numbers<[1], [0], [0], [1], [0, 0, 1, 1], [], []>} : vector<16x8xf32>, vector<8x8xf32>, vector<16x8xf32> -> vector<16x8xf32>
    %c200_70 = arith.constant 200 : index
    %c0_71 = arith.constant 0 : index
    %187 = vector.load %arg2[%c200_70, %c0_71] : memref<528x24xf32, #tpu.memory_space<vmem>>, vector<16x8xf32>
    %188 = arith.addf %186, %187 : vector<16x8xf32>
    %189 = arith.addf %184, %188 : vector<16x8xf32>
    %c360 = arith.constant 360 : index
    %c0_72 = arith.constant 0 : index
    %190 = vector.load %arg2[%c360, %c0_72] : memref<528x24xf32, #tpu.memory_space<vmem>>, vector<8x24xf32>
    %cst_73 = arith.constant dense<0.000000e+00> : vector<16x24xf32>
    %191 = tpu.matmul %5, %190, %cst_73 {dimension_numbers = #tpu.dot_dimension_numbers<[1], [0], [0], [1], [0, 0, 1, 1], [], []>} : vector<16x8xf32>, vector<8x24xf32>, vector<16x24xf32> -> vector<16x24xf32>
    %c368 = arith.constant 368 : index
    %c0_74 = arith.constant 0 : index
    %192 = vector.load %arg2[%c368, %c0_74] : memref<528x24xf32, #tpu.memory_space<vmem>>, vector<16x24xf32>
    %193 = arith.addf %191, %192 : vector<16x24xf32>
    %194 = vector.extract_strided_slice %193 {offsets = [0, 0], sizes = [16, 8], strides = [1, 1]} : vector<16x24xf32> to vector<16x8xf32>
    %195 = vector.extract_strided_slice %193 {offsets = [0, 8], sizes = [16, 8], strides = [1, 1]} : vector<16x24xf32> to vector<16x8xf32>
    %196 = vector.extract_strided_slice %193 {offsets = [0, 16], sizes = [16, 8], strides = [1, 1]} : vector<16x24xf32> to vector<16x8xf32>
    %197 = tpu.concatenate %194, %194, %194, %194 in 0 : vector<16x8xf32>, vector<16x8xf32>, vector<16x8xf32>, vector<16x8xf32> -> vector<64x8xf32>
    %198 = arith.mulf %197, %1 : vector<64x8xf32>
    %199 = tpu.transpose %195, [1, 0] : vector<16x8xf32> -> vector<8x16xf32>
    %cst_75 = arith.constant dense<0.000000e+00> : vector<64x16xf32>
    %200 = tpu.matmul %198, %199, %cst_75 {dimension_numbers = #tpu.dot_dimension_numbers<[1], [0], [0], [1], [0, 0, 1, 1], [], []>} : vector<64x8xf32>, vector<8x16xf32>, vector<64x16xf32> -> vector<64x16xf32>
    %201 = arith.addf %200, %2 : vector<64x16xf32>
    %cst_76 = arith.constant dense<0xFF800000> : vector<64xf32>
    %202 = vector.multi_reduction <maximumf>, %201, %cst_76 [1] : vector<64x16xf32> to vector<64xf32>
    %203 = vector.shape_cast %202 : vector<64xf32> to vector<64x1xf32>
    %204 = vector.broadcast %203 : vector<64x1xf32> to vector<64x16xf32>
    %205 = arith.subf %201, %204 : vector<64x16xf32>
    %206 = math.exp %205 : vector<64x16xf32>
    %cst_77 = arith.constant dense<0.000000e+00> : vector<64xf32>
    %207 = vector.multi_reduction <add>, %206, %cst_77 [1] : vector<64x16xf32> to vector<64xf32>
    %208 = vector.shape_cast %207 : vector<64xf32> to vector<64x1xf32>
    %209 = tpu.reciprocal %208 {approx = true} : vector<64x1xf32> -> vector<64x1xf32>
    %210 = vector.broadcast %209 : vector<64x1xf32> to vector<64x16xf32>
    %211 = arith.mulf %206, %210 : vector<64x16xf32>
    %cst_78 = arith.constant dense<0.000000e+00> : vector<64x8xf32>
    %212 = tpu.matmul %211, %196, %cst_78 {dimension_numbers = #tpu.dot_dimension_numbers<[1], [0], [0], [1], [0, 0, 1, 1], [], []>} : vector<64x16xf32>, vector<16x8xf32>, vector<64x8xf32> -> vector<64x8xf32>
    %213 = arith.mulf %212, %1 : vector<64x8xf32>
    %214 = vector.extract_strided_slice %213 {offsets = [0, 0], sizes = [16, 8], strides = [1, 1]} : vector<64x8xf32> to vector<16x8xf32>
    %215 = vector.extract_strided_slice %213 {offsets = [16, 0], sizes = [16, 8], strides = [1, 1]} : vector<64x8xf32> to vector<16x8xf32>
    %216 = arith.addf %214, %215 : vector<16x8xf32>
    %217 = vector.extract_strided_slice %213 {offsets = [32, 0], sizes = [16, 8], strides = [1, 1]} : vector<64x8xf32> to vector<16x8xf32>
    %218 = arith.addf %216, %217 : vector<16x8xf32>
    %219 = vector.extract_strided_slice %213 {offsets = [48, 0], sizes = [16, 8], strides = [1, 1]} : vector<64x8xf32> to vector<16x8xf32>
    %220 = arith.addf %218, %219 : vector<16x8xf32>
    %c384 = arith.constant 384 : index
    %c0_79 = arith.constant 0 : index
    %221 = vector.load %arg2[%c384, %c0_79] : memref<528x24xf32, #tpu.memory_space<vmem>>, vector<8x8xf32>
    %cst_80 = arith.constant dense<0.000000e+00> : vector<16x8xf32>
    %222 = tpu.matmul %220, %221, %cst_80 {dimension_numbers = #tpu.dot_dimension_numbers<[1], [0], [0], [1], [0, 0, 1, 1], [], []>} : vector<16x8xf32>, vector<8x8xf32>, vector<16x8xf32> -> vector<16x8xf32>
    %c392 = arith.constant 392 : index
    %c0_81 = arith.constant 0 : index
    %223 = vector.load %arg2[%c392, %c0_81] : memref<528x24xf32, #tpu.memory_space<vmem>>, vector<16x8xf32>
    %224 = arith.addf %222, %223 : vector<16x8xf32>
    %225 = arith.addf %5, %224 : vector<16x8xf32>
    %c408 = arith.constant 408 : index
    %c0_82 = arith.constant 0 : index
    %226 = vector.load %arg2[%c408, %c0_82] : memref<528x24xf32, #tpu.memory_space<vmem>>, vector<8x8xf32>
    %cst_83 = arith.constant dense<0.000000e+00> : vector<16x8xf32>
    %227 = tpu.matmul %225, %226, %cst_83 {dimension_numbers = #tpu.dot_dimension_numbers<[1], [0], [0], [1], [0, 0, 1, 1], [], []>} : vector<16x8xf32>, vector<8x8xf32>, vector<16x8xf32> -> vector<16x8xf32>
    %c416 = arith.constant 416 : index
    %c0_84 = arith.constant 0 : index
    %228 = vector.load %arg2[%c416, %c0_84] : memref<528x24xf32, #tpu.memory_space<vmem>>, vector<16x8xf32>
    %229 = arith.addf %227, %228 : vector<16x8xf32>
    %c432 = arith.constant 432 : index
    %c0_85 = arith.constant 0 : index
    %230 = vector.load %arg2[%c432, %c0_85] : memref<528x24xf32, #tpu.memory_space<vmem>>, vector<8x16xf32>
    %cst_86 = arith.constant dense<0.000000e+00> : vector<16x16xf32>
    %231 = tpu.matmul %189, %230, %cst_86 {dimension_numbers = #tpu.dot_dimension_numbers<[1], [0], [0], [1], [0, 0, 1, 1], [], []>} : vector<16x8xf32>, vector<8x16xf32>, vector<16x16xf32> -> vector<16x16xf32>
    %c440 = arith.constant 440 : index
    %c0_87 = arith.constant 0 : index
    %232 = vector.load %arg2[%c440, %c0_87] : memref<528x24xf32, #tpu.memory_space<vmem>>, vector<16x16xf32>
    %233 = arith.addf %231, %232 : vector<16x16xf32>
    %234 = vector.extract_strided_slice %233 {offsets = [0, 0], sizes = [16, 8], strides = [1, 1]} : vector<16x16xf32> to vector<16x8xf32>
    %235 = vector.extract_strided_slice %233 {offsets = [0, 8], sizes = [16, 8], strides = [1, 1]} : vector<16x16xf32> to vector<16x8xf32>
    %236 = tpu.concatenate %229, %229, %229, %229 in 0 : vector<16x8xf32>, vector<16x8xf32>, vector<16x8xf32>, vector<16x8xf32> -> vector<64x8xf32>
    %237 = arith.mulf %236, %1 : vector<64x8xf32>
    %238 = tpu.transpose %234, [1, 0] : vector<16x8xf32> -> vector<8x16xf32>
    %cst_88 = arith.constant dense<0.000000e+00> : vector<64x16xf32>
    %239 = tpu.matmul %237, %238, %cst_88 {dimension_numbers = #tpu.dot_dimension_numbers<[1], [0], [0], [1], [0, 0, 1, 1], [], []>} : vector<64x8xf32>, vector<8x16xf32>, vector<64x16xf32> -> vector<64x16xf32>
    %240 = arith.addf %239, %2 : vector<64x16xf32>
    %cst_89 = arith.constant dense<0xFF800000> : vector<64xf32>
    %241 = vector.multi_reduction <maximumf>, %240, %cst_89 [1] : vector<64x16xf32> to vector<64xf32>
    %242 = vector.shape_cast %241 : vector<64xf32> to vector<64x1xf32>
    %243 = vector.broadcast %242 : vector<64x1xf32> to vector<64x16xf32>
    %244 = arith.subf %240, %243 : vector<64x16xf32>
    %245 = math.exp %244 : vector<64x16xf32>
    %cst_90 = arith.constant dense<0.000000e+00> : vector<64xf32>
    %246 = vector.multi_reduction <add>, %245, %cst_90 [1] : vector<64x16xf32> to vector<64xf32>
    %247 = vector.shape_cast %246 : vector<64xf32> to vector<64x1xf32>
    %248 = tpu.reciprocal %247 {approx = true} : vector<64x1xf32> -> vector<64x1xf32>
    %249 = vector.broadcast %248 : vector<64x1xf32> to vector<64x16xf32>
    %250 = arith.mulf %245, %249 : vector<64x16xf32>
    %cst_91 = arith.constant dense<0.000000e+00> : vector<64x8xf32>
    %251 = tpu.matmul %250, %235, %cst_91 {dimension_numbers = #tpu.dot_dimension_numbers<[1], [0], [0], [1], [0, 0, 1, 1], [], []>} : vector<64x16xf32>, vector<16x8xf32>, vector<64x8xf32> -> vector<64x8xf32>
    %252 = arith.mulf %251, %1 : vector<64x8xf32>
    %253 = vector.extract_strided_slice %252 {offsets = [0, 0], sizes = [16, 8], strides = [1, 1]} : vector<64x8xf32> to vector<16x8xf32>
    %254 = vector.extract_strided_slice %252 {offsets = [16, 0], sizes = [16, 8], strides = [1, 1]} : vector<64x8xf32> to vector<16x8xf32>
    %255 = arith.addf %253, %254 : vector<16x8xf32>
    %256 = vector.extract_strided_slice %252 {offsets = [32, 0], sizes = [16, 8], strides = [1, 1]} : vector<64x8xf32> to vector<16x8xf32>
    %257 = arith.addf %255, %256 : vector<16x8xf32>
    %258 = vector.extract_strided_slice %252 {offsets = [48, 0], sizes = [16, 8], strides = [1, 1]} : vector<64x8xf32> to vector<16x8xf32>
    %259 = arith.addf %257, %258 : vector<16x8xf32>
    %c456 = arith.constant 456 : index
    %c0_92 = arith.constant 0 : index
    %260 = vector.load %arg2[%c456, %c0_92] : memref<528x24xf32, #tpu.memory_space<vmem>>, vector<8x8xf32>
    %cst_93 = arith.constant dense<0.000000e+00> : vector<16x8xf32>
    %261 = tpu.matmul %259, %260, %cst_93 {dimension_numbers = #tpu.dot_dimension_numbers<[1], [0], [0], [1], [0, 0, 1, 1], [], []>} : vector<16x8xf32>, vector<8x8xf32>, vector<16x8xf32> -> vector<16x8xf32>
    %c464 = arith.constant 464 : index
    %c0_94 = arith.constant 0 : index
    %262 = vector.load %arg2[%c464, %c0_94] : memref<528x24xf32, #tpu.memory_space<vmem>>, vector<16x8xf32>
    %263 = arith.addf %261, %262 : vector<16x8xf32>
    %264 = arith.addf %225, %263 : vector<16x8xf32>
    %c480 = arith.constant 480 : index
    %c0_95 = arith.constant 0 : index
    %265 = vector.load %arg2[%c480, %c0_95] : memref<528x24xf32, #tpu.memory_space<vmem>>, vector<8x8xf32>
    %cst_96 = arith.constant dense<0.000000e+00> : vector<16x8xf32>
    %266 = tpu.matmul %264, %265, %cst_96 {dimension_numbers = #tpu.dot_dimension_numbers<[1], [0], [0], [1], [0, 0, 1, 1], [], []>} : vector<16x8xf32>, vector<8x8xf32>, vector<16x8xf32> -> vector<16x8xf32>
    %c488 = arith.constant 488 : index
    %c0_97 = arith.constant 0 : index
    %267 = vector.load %arg2[%c488, %c0_97] : memref<528x24xf32, #tpu.memory_space<vmem>>, vector<16x8xf32>
    %268 = arith.addf %266, %267 : vector<16x8xf32>
    %269 = arith.addf %264, %268 : vector<16x8xf32>
    %c504_98 = arith.constant 504 : index
    %c0_99 = arith.constant 0 : index
    %270 = vector.load %arg2[%c504_98, %c0_99] : memref<528x24xf32, #tpu.memory_space<vmem>>, vector<8x4xf32>
    %cst_100 = arith.constant dense<0.000000e+00> : vector<16x4xf32>
    %271 = tpu.matmul %269, %270, %cst_100 {dimension_numbers = #tpu.dot_dimension_numbers<[1], [0], [0], [1], [0, 0, 1, 1], [], []>} : vector<16x8xf32>, vector<8x4xf32>, vector<16x4xf32> -> vector<16x4xf32>
    %c512_101 = arith.constant 512 : index
    %c0_102 = arith.constant 0 : index
    %272 = vector.load %arg2[%c512_101, %c0_102] : memref<528x24xf32, #tpu.memory_space<vmem>>, vector<16x4xf32>
    %273 = arith.addf %271, %272 : vector<16x4xf32>
    %cst_103 = arith.constant 0.000000e+00 : f32
    %274 = vector.broadcast %cst_103 : f32 to vector<16x4xf32>
    %275 = arith.subf %274, %273 : vector<16x4xf32>
    %276 = math.exp %275 : vector<16x4xf32>
    %cst_104 = arith.constant 1.000000e+00 : f32
    %277 = vector.broadcast %cst_104 : f32 to vector<16x4xf32>
    %278 = arith.addf %277, %276 : vector<16x4xf32>
    %cst_105 = arith.constant 1.000000e+00 : f32
    %279 = vector.broadcast %cst_105 : f32 to vector<16x4xf32>
    %280 = arith.divf %279, %278 : vector<16x4xf32>
    %281 = tpu.concatenate %142, %280 in 1 : vector<16x4xf32>, vector<16x4xf32> -> vector<16x8xf32>
    %c0_106 = arith.constant 0 : index
    %c0_107 = arith.constant 0 : index
    %282 = vector.load %arg3[%c0_106, %c0_107] : memref<16x8xf32, #tpu.memory_space<vmem>>, vector<16x8xf32>
    tpu.vector_store %arg3[%c0_106, %c0_107], %281 {strides = array<i32>} : memref<16x8xf32, #tpu.memory_space<vmem>>, vector<16x8xf32>,
    return
  }
  func.func @transform_0(%arg0: i32) -> (i32, i32) {
    %c0_i32 = arith.constant 0 : i32
    %c0_i32_0 = arith.constant 0 : i32
    %c0_i32_1 = arith.constant 0 : i32
    return %c0_i32, %c0_i32_0 : i32, i32
  }
  func.func @transform_1(%arg0: i32) -> (i32, i32) {
    %c0_i32 = arith.constant 0 : i32
    %c0_i32_0 = arith.constant 0 : i32
    %c0_i32_1 = arith.constant 0 : i32
    return %c0_i32, %c0_i32_0 : i32, i32
  }
  func.func @transform_2(%arg0: i32) -> (i32, i32) {
    %c0_i32 = arith.constant 0 : i32
    %c0_i32_0 = arith.constant 0 : i32
    %c0_i32_1 = arith.constant 0 : i32
    return %c0_i32, %c0_i32_0 : i32, i32
  }
}

</mosaic_0001>

<bundles_post_ra>
// kernel: tpu_custom_call.1
= control target key start
LH: loop header
LB: loop body
LE: loop exit
PB: predicated region body
PF: predicated region fallthrough
CT: control target
= control target key end

     0   :  { %vm39_vm0 = vcmask 31744   ;;  %vm51_vm1 = vcmask 64512   ;;  %s5067_s25 = smov 120   ;;  %vm280_vm3 = vcmask 130048   ;;  %s5068_s29 = smov 112   ;;  %s6077_s1 = inlined_call_operand.vmem [shape: f32[528,24], index: 1, kind: input, shape index: {}]   ;;  %s6078_s0 = inlined_call_operand.vmem [shape: f32[16,8], index: 0, kind: input, shape index: {}]   ;;  %s6079_s2 = inlined_call_operand.vmem [shape: f32[16,8], index: 2, kind: output, shape index: {}]  }
   0x1   :  { %v48_v0 = vld [vmem:[%s6077_s1 + $0x90] sm:$0xff]  ;;  %v5092_v1 = vld [vmem:[%s6078_s0] sm:$0xff]  ;;  %v5100_v3 = vld [vmem:[%s6078_s0 + $0x8] sm:$0xff]  ;;  %s5069_s30 = smov 124   ;;  %s5070_s28 = smov 4  }
   0x2   :  { %4414 = vmatprep.subr.mxu0 %v48_v0  ;;  %v11_v2 = vld [vmem:[%s6077_s1] sm:$0xff]  ;;  %v42_v4 = vsel %vm39_vm0, %v5092_v1, 0.0  ;;  %v12_v6 = vld [vmem:[%s6077_s1 + $0x8] sm:$0xff]  ;;  %v43_v7 = vsel %vm39_vm0, %v5100_v3, 0.0  ;;  %v49_v12 = vld [vmem:[%s6077_s1 + $0x98] sm:$0xff] }
   0x3   :  { %4415 = vmatpush3.msra.mxu0 %v48_v0  ;;  %v44_v5 = vmul.f32 2.0, %v42_v4  ;;  %v45_v8 = vmul.f32 2.0, %v43_v7  ;;  %v50_v11 = vld [vmem:[%s6077_s1 + $0xa0] sm:$0xff]  ;;  %v5126_v16 = vld [vmem:[%s6077_s1 + $0x10] sm:$0xff]  ;;  %vm5136_vm2 = vmpackc.low %vm51_vm1, %vm51_vm1 }
   0x4   :  { %v5147_v25 = vld [vmem:[%s6077_s1 + $0x18] sm:$0xff]  ;;  %v5152_v26 = vld [vmem:[%s6077_s1 + $0x20] sm:$0xff]  ;;  %v5159_v29 = vld [vmem:[%s6077_s1 + $0x28] sm:$0xff] }
   0x5   :  { %v5109_v9 = vadd.f32 %v44_v5, %v11_v2  ;;  %v5111_v10 = vadd.f32 %v45_v8, %v12_v6  ;;  %v5165_v30 = vld [vmem:[%s6077_s1 + $0x30] sm:$0xff]  ;;  %v5173_v33 = vld [vmem:[%s6077_s1 + $0x38] sm:$0xff]  ;;  %v5179_v34 = vld [vmem:[%s6077_s1 + $0x40] sm:$0xff] }
   0x6   :  { %v5187_v37 = vld [vmem:[%s6077_s1 + $0x48] sm:$0xff]  ;;  %v5196_v39 = vld [vmem:[%s6077_s1 + $0x58] sm:$0xff]  ;;  %v5201_v40 = vld [vmem:[%s6077_s1 + $0x50] sm:$0xff] }
   0x7   :  { %4416 = vmatprep.mubr.msk.f32.mxu0 %vm51_vm1, %v5109_v9  ;;  %v5208_v45 = vld [vmem:[%s6077_s1 + $0x68] sm:$0xff]  ;;  %v5214_v48 = vld [vmem:[%s6077_s1 + $0x60] sm:$0xff]  ;;  %v5223_v54 = vld [vmem:[%s6077_s1 + $0x78] sm:$0xff] }
   0x8   :  { %4417 = vmatmul.mubr.msk.f32.vlgmr.msra.gmra.mrb[0].mxu0 %vm51_vm1, %v5111_v10  ;;  %v5230_v59 = vld [vmem:[%s6077_s1 + $0x70] sm:$0xff]  ;;  %v5237_v0 = vld [vmem:[%s6077_s1 + $0x80] sm:$0xff]  ;;  %v5244_v5 = vld [vmem:[%s6077_s1 + $0x88] sm:$0xff] }
  0xdb   :  { %v4418_v13 = vpop.f32.mrb[0].mxu0 }
  0xdc   :  { %v130_v14 = vadd.f32 %v4418_v13, %v50_v11  ;;  %v124_v15 = vpop.f32.mrb[1].mxu0 }
  0xdd   :  { %v125_v17 = vadd.f32 %v124_v15, %v49_v12 }
  0xde   :  { %v134_v27 = vmul.f32 %v130_v14, %v5147_v25  ;;  %v136_v31 = vmul.f32 %v130_v14, %v5159_v29  ;;  %v138_v35 = vmul.f32 %v130_v14, %v5173_v33  ;;  %v140_v38 = vmul.f32 %v130_v14, %v5187_v37 }
  0xdf   :  { %v5128_v18 = vpack.i.bf16 %v130_v14, %v125_v17  ;;  %v133_v19 = vmul.f32 %v125_v17, %v5126_v16  ;;  %v135_v28 = vmul.f32 %v125_v17, %v5152_v26  ;;  %v137_v32 = vmul.f32 %v125_v17, %v5165_v30 }
  0xe0   :  { %v139_v36 = vmul.f32 %v125_v17, %v5179_v34 }
  0xe1   :  { %4771 = vrot.lane.b32.xlu0 %v5128_v18, %s5067_s25  ;;  %4423 = vmatprep.mubr.msk.f32.mxu1 %vm51_vm1, %v133_v19 }
 0x153   :  { %v4772_v20 = vpop.permute.xlu0 %4771 }
 0x154   :  { %v4774_v21 = vunpack.i.h.bf16 %v4772_v20  ;;  %v4773_v22 = vunpack.i.l.bf16 %v4772_v20 }
 0x156   :  { %v4706_v24 = vpack.c.bf16 %v4774_v21, %v4773_v22 }
 0x158   :  { %4708 = vmatprep.subr.msk.bf16.mxu1 %vm5136_vm2, %v4706_v24 }
 0x159   :  { %4711 = vmatpush3.bf16.xpose.msk.msra.mxu1 %vm5136_vm2, %v4706_v24 }
 0x160   :  { %4424 = vmatmul.mubr.msk.f32.vlgmr.msra.gmra.mrb[0].mxu1 %vm51_vm1, %v134_v27 }
 0x161   :  { %4426 = vmatprep.mubr.msk.f32.mxu1 %vm51_vm1, %v135_v28 }
 0x164   :  { %4427 = vmatmul.mubr.msk.f32.gmra.mrb[2].mxu1 %vm51_vm1, %v136_v31 }
 0x165   :  { %4429 = vmatprep.mubr.msk.f32.mxu1 %vm51_vm1, %v137_v32 }
 0x168   :  { %4430 = vmatmul.mubr.msk.f32.gmra.mrb[4].mxu1 %vm51_vm1, %v138_v35 }
 0x169   :  { %4432 = vmatprep.mubr.msk.f32.mxu1 %vm51_vm1, %v139_v36 }
 0x16c   :  { %4433 = vmatmul.mubr.msk.f32.gmra.mrb[6].mxu1 %vm51_vm1, %v140_v38 }
 0x233   :  { %v4425_v41 = vpop.f32.mrb[0].mxu1 }
 0x234   :  { %v247_v42 = vadd.f32 %v4425_v41, %v5196_v39  ;;  %v241_v43 = vpop.f32.mrb[1].mxu1 }
 0x235   :  { %v242_v44 = vadd.f32 %v241_v43, %v5201_v40 }
 0x236   :  { %v284_v46 = vsel %vm280_vm3, %v247_v42, -inf }
 0x237   :  { %285 = vmax.xlane.f32.xlu1 %v284_v46  ;;  %v4428_v47 = vpop.f32.mrb[2].mxu1  ;;  %v281_v49 = vsel %vm280_vm3, %v242_v44, -inf }
 0x238   :  { %v257_v50 = vadd.f32 %v4428_v47, %v5208_v45  ;;  %v251_v51 = vpop.f32.mrb[3].mxu1  ;;  %282 = vmax.xlane.f32.xlu0 %v281_v49 }
 0x239   :  { %v252_v52 = vadd.f32 %v251_v51, %v5214_v48 }
 0x23a   :  { %v290_v53 = vsel %vm280_vm3, %v257_v50, -inf }
 0x23b   :  { %291 = vmax.xlane.f32.xlu1 %v290_v53  ;;  %v4431_v55 = vpop.f32.mrb[4].mxu1  ;;  %v287_v58 = vsel %vm280_vm3, %v252_v52, -inf }
 0x23c   :  { %v261_v56 = vpop.f32.mrb[5].mxu1  ;;  %v267_v57 = vadd.f32 %v4431_v55, %v5223_v54 }
 0x23d   :  { %v262_v62 = vadd.f32 %v261_v56, %v5230_v59 }
 0x23e   :  { %v296_v63 = vsel %vm280_vm3, %v267_v57, -inf }
 0x23f   :  { %v4434_v60 = vpop.f32.mrb[6].mxu1  ;;  %288 = vmax.xlane.f32.xlu1 %v287_v58  ;;  %v293_v4 = vsel %vm280_vm3, %v262_v62, -inf }
 0x240   :  { %v271_v61 = vpop.f32.mrb[7].mxu1  ;;  %v277_v6 = vadd.f32 %v4434_v60, %v5244_v5 }
 0x241   :  { %v272_v2 = vadd.f32 %v271_v61, %v5237_v0 }
 0x242   :  { %v302_v8 = vsel %vm280_vm3, %v277_v6, -inf }
 0x243   :  { %297 = vmax.xlane.f32.xlu1 %v296_v63  ;;  %v299_v7 = vsel %vm280_vm3, %v272_v2, -inf }
 0x247   :  { %294 = vmax.xlane.f32.xlu1 %v293_v4 }
 0x24b   :  { %300 = vmax.xlane.f32.xlu1 %v299_v7 }
 0x24f   :  { %303 = vmax.xlane.f32.xlu1 %v302_v8 }
 0x2c4   :  { %v286_v11 = vpop.xlane.xlu1 %285 }
 0x2c5   :  { %v306_v12 = vsub.f32 %v247_v42, %v286_v11  ;;  %v283_v13 = vpop.xlane.xlu0 %282 }
 0x2c6   :  { %v305_v14 = vsub.f32 %v242_v44, %v283_v13 }
 0x2c7   :  { %v315_v15 = vmul.f32 1.442695, %v306_v12 }
 0x2c8   :  { %v313_v17 = vmul.f32 1.442695, %v305_v14  ;;  %v292_v19 = vpop.xlane.xlu1 %291 }
 0x2c9   :  { %v308_v20 = vsub.f32 %v257_v50, %v292_v19 }
 0x2ca   :  { %4820 = vpow2.f32 %v313_v17 }
 0x2cb   :  { %4822 = vpow2.f32 %v315_v15  ;;  %v319_v21 = vmul.f32 1.442695, %v308_v20 }
 0x2cc   :  { %v289_v22 = vpop.xlane.xlu1 %288 }
 0x2cd   :  { %v307_v24 = vsub.f32 %v252_v52, %v289_v22  ;;  %4824 = vpow2.f32 %v319_v21 }
 0x2cf   :  { %v317_v27 = vmul.f32 1.442695, %v307_v24 }
 0x2d0   :  { %v298_v28 = vpop.xlane.xlu1 %297 }
 0x2d1   :  { %4826 = vpow2.f32 %v317_v27  ;;  %v310_v31 = vsub.f32 %v267_v57, %v298_v28 }
 0x2d3   :  { %v323_v32 = vmul.f32 1.442695, %v310_v31 }
 0x2d4   :  { %v4821_v35 = vpop.eup %4820  ;;  %v295_v36 = vpop.xlane.xlu1 %294 }
 0x2d5   :  { %4828 = vpow2.f32 %v323_v32  ;;  %v309_v38 = vsub.f32 %v262_v62, %v295_v36  ;;  %v329_v41 = vsel %vm280_vm3, %v4821_v35, 0.0  ;;  %v5250_v42 = vpop.eup %4822 }
 0x2d6   :  { %330 = vadd.xlane.f32.xlu1 %v329_v41  ;;  %v332_v47 = vsel %vm280_vm3, %v5250_v42, 0.0 }
 0x2d7   :  { %v321_v43 = vmul.f32 1.442695, %v309_v38  ;;  %v5254_v49 = vpop.eup %4824 }
 0x2d8   :  { %v301_v44 = vpop.xlane.xlu1 %300  ;;  %v338_v56 = vsel %vm280_vm3, %v5254_v49, 0.0 }
 0x2d9   :  { %4830 = vpow2.f32 %v321_v43  ;;  %v311_v46 = vsub.f32 %v272_v2, %v301_v44 }
 0x2da   :  { %333 = vadd.xlane.f32.xlu1 %v332_v47 }
 0x2db   :  { %v4827_v50 = vpop.eup %4826  ;;  %v325_v51 = vmul.f32 1.442695, %v311_v46 }
 0x2dc   :  { %v304_v52 = vpop.xlane.xlu1 %303  ;;  %v335_v53 = vsel %vm280_vm3, %v4827_v50, 0.0 }
 0x2dd   :  { %4832 = vpow2.f32 %v325_v51  ;;  %v312_v55 = vsub.f32 %v277_v6, %v304_v52  ;;  %336 = vadd.xlane.f32.xlu0 %v335_v53 }
 0x2de   :  { %339 = vadd.xlane.f32.xlu1 %v338_v56 }
 0x2df   :  { %v4829_v57 = vpop.eup %4828  ;;  %v327_v58 = vmul.f32 1.442695, %v312_v55 }
 0x2e0   :  { %v344_v60 = vsel %vm280_vm3, %v4829_v57, 0.0 }
 0x2e1   :  { %4834 = vpow2.f32 %v327_v58 }
 0x2e2   :  { %345 = vadd.xlane.f32.xlu1 %v344_v60 }
 0x2e3   :  { %v4831_v61 = vpop.eup %4830 }
 0x2e4   :  { %v341_v62 = vsel %vm280_vm3, %v4831_v61, 0.0 }
 0x2e5   :  { %342 = vadd.xlane.f32.xlu0 %v341_v62 }
 0x2e7   :  { %v4833_v63 = vpop.eup %4832 }
 0x2e8   :  { %v347_v2 = vsel %vm280_vm3, %v4833_v63, 0.0 }
 0x2e9   :  { %348 = vadd.xlane.f32.xlu0 %v347_v2 }
 0x2eb   :  { %v4835_v4 = vpop.eup %4834 }
 0x2ec   :  { %v350_v6 = vsel %vm280_vm3, %v4835_v4, 0.0 }
 0x2ed   :  { %351 = vadd.xlane.f32.xlu1 %v350_v6 }
 0x2fe   :  { %33 = vrot.lane.b32.xlu1 %v5092_v1, %s5069_s30 }
 0x2ff   :  { %4776 = vrot.lane.b32.xlu0 %v5128_v18, %s5068_s29 }
 0x302   :  { %35 = vrot.lane.b32.xlu1 %v5100_v3, %s5069_s30 }
 0x363   :  { %v331_v7 = vpop.xlane.xlu1 %330 }
 0x364   :  { %4836 = vrcp.f32 %v331_v7 }
 0x367   :  { %v334_v8 = vpop.xlane.xlu1 %333 }
 0x368   :  { %4838 = vrcp.f32 %v334_v8 }
 0x36a   :  { %v337_v12 = vpop.xlane.xlu0 %336 }
 0x36b   :  { %v340_v15 = vpop.xlane.xlu1 %339  ;;  %4840 = vrcp.f32 %v337_v12 }
 0x36c   :  { %4842 = vrcp.f32 %v340_v15 }
 0x36e   :  { %v4837_v11 = vpop.eup %4836 }
 0x36f   :  { %v361_v13 = vmul.f32 %v4837_v11, %v4821_v35  ;;  %v346_v18 = vpop.xlane.xlu1 %345 }
 0x371   :  { %4439 = vmatprep.mubr.msk.f32.mxu0 %vm280_vm3, %v361_v13 }
 0x372   :  { %v343_v14 = vpop.xlane.xlu0 %342  ;;  %v4839_v27 = vpop.eup %4838 }
 0x373   :  { %4844 = vrcp.f32 %v343_v14  ;;  %v362_v31 = vmul.f32 %v4839_v27, %v5250_v42 }
 0x374   :  { %4846 = vrcp.f32 %v346_v18 }
 0x375   :  { %v4841_v28 = vpop.eup %4840 }
 0x376   :  { %v349_v17 = vpop.xlane.xlu0 %348  ;;  %v4843_v32 = vpop.eup %4842  ;;  %v363_v35 = vmul.f32 %v4841_v28, %v4827_v50  ;;  %v690_v50 = vld [vmem:[%s6077_s1 + $0xd8] sm:$0xff] }
 0x377   :  { %4848 = vrcp.f32 %v349_v17  ;;  %v364_v38 = vmul.f32 %v4843_v32, %v5254_v49  ;;  %v518_v49 = vld [vmem:[%s6077_s1 + $0xa8] sm:$0xff] }
 0x37a   :  { %v4777_v19 = vpop.permute.xlu0 %4776  ;;  %v352_v22 = vpop.xlane.xlu1 %351 }
 0x37b   :  { %v4779_v20 = vunpack.i.h.bf16 %v4777_v19  ;;  %v4778_v21 = vunpack.i.l.bf16 %v4777_v19  ;;  %4850 = vrcp.f32 %v352_v22 }
 0x37d   :  { %v4712_v24 = vpack.c.bf16 %v4779_v20, %v4778_v21  ;;  %v4845_v36 = vpop.eup %4844 }
 0x37e   :  { %v4847_v41 = vpop.eup %4846  ;;  %v365_v43 = vmul.f32 %v4845_v36, %v4831_v61  ;;  %v34_v11 = vpop.permute.xlu1 %33  ;;  %v691_v36 = vld [vmem:[%s6077_s1 + $0xe0] sm:$0xff] }
 0x37f   :  { %4713 = vmatprep.subr.bf16.mxu0 %v4712_v24  ;;  %v366_v46 = vmul.f32 %v4847_v41, %v4829_v57  ;;  %v5293_v20 = vsel %vm39_vm0, %v34_v11, %v5092_v1  ;;  %v5308_v1 = vld [vmem:[%s6077_s1 + $0xc0] sm:$0xff] }
 0x380   :  { %4715 = vmatpush3.bf16.msra.mxu0 %v4712_v24  ;;  %4456 = vmatprep.subr.mxu1 %v5308_v1  ;;  %v520_v24 = vld [vmem:[%s6077_s1 + $0xb8] sm:$0xff] }
 0x381   :  { %v4849_v44 = vpop.eup %4848  ;;  %4451 = vmatprep.subr.mxu0 %v518_v49  ;;  %4457 = vmatpush3.msra.mxu1 %v5308_v1 }
 0x382   :  { %v367_v51 = vmul.f32 %v4849_v44, %v4833_v63  ;;  %v36_v21 = vpop.permute.xlu1 %35 }
 0x383   :  { %4440 = vmatmul.mubr.msk.f32.vlgmr.msra.gmra.mrb[2].mxu0 %vm280_vm3, %v362_v31  ;;  %v5301_v22 = vsel %vm39_vm0, %v36_v21, %v5100_v3  ;;  %v519_v3 = vld [vmem:[%s6077_s1 + $0xb0] sm:$0xff] }
 0x384   :  { %4442 = vmatprep.mubr.msk.f32.mxu0 %vm280_vm3, %v363_v35  ;;  %4452 = vmatpush3.msra.mxu0 %v518_v49  ;;  %v692_v35 = vld [vmem:[%s6077_s1 + $0xe8] sm:$0xff] }
 0x385   :  { %v4851_v47 = vpop.eup %4850  ;;  %4461 = vmatprep.subr.mxu0 %v690_v50 }
 0x386   :  { %v368_v42 = vmul.f32 %v4851_v47, %v4835_v4 }
 0x387   :  { %4443 = vmatmul.mubr.msk.f32.gmra.mrb[4].mxu0 %vm280_vm3, %v364_v38 }
 0x388   :  { %4445 = vmatprep.mubr.msk.f32.mxu0 %vm280_vm3, %v365_v43 }
 0x38b   :  { %4446 = vmatmul.mubr.msk.f32.gmra.mrb[6].mxu0 %vm280_vm3, %v366_v46 }
 0x38c   :  { %4448 = vmatprep.mubr.msk.f32.mxu0 %vm280_vm3, %v367_v51 }
 0x38f   :  { %4449 = vmatmul.mubr.msk.f32.gmra.mrb[8].mxu0 %vm280_vm3, %v368_v42 }
 0x456   :  { %v4441_v52 = vpop.f32.mrb[2].mxu0 }
 0x457   :  { %v465_v53 = vpop.f32.mrb[3].mxu0  ;;  %v505_v56 = vmul.f32 %v4441_v52, %v5147_v25 }
 0x458   :  { %v504_v60 = vmul.f32 %v465_v53, %v5126_v16 }
 0x45a   :  { %v4444_v55 = vpop.f32.mrb[4].mxu0 }
 0x45b   :  { %v507_v57 = vmul.f32 %v4444_v55, %v5159_v29  ;;  %v475_v58 = vpop.f32.mrb[5].mxu0 }
 0x45c   :  { %v506_v61 = vmul.f32 %v475_v58, %v5152_v26 }
 0x45d   :  { %v513_v62 = vadd.f32 %v507_v57, %v505_v56 }
 0x45e   :  { %v512_v63 = vadd.f32 %v506_v61, %v504_v60  ;;  %v4447_v2 = vpop.f32.mrb[6].mxu0 }
 0x45f   :  { %v509_v4 = vmul.f32 %v4447_v2, %v5173_v33  ;;  %v485_v6 = vpop.f32.mrb[7].mxu0 }
 0x460   :  { %v508_v7 = vmul.f32 %v485_v6, %v5165_v30 }
 0x461   :  { %v515_v8 = vadd.f32 %v513_v62, %v509_v4 }
 0x462   :  { %v514_v12 = vadd.f32 %v512_v63, %v508_v7  ;;  %v4450_v13 = vpop.f32.mrb[8].mxu0 }
 0x463   :  { %v511_v14 = vmul.f32 %v4450_v13, %v5187_v37  ;;  %v495_v15 = vpop.f32.mrb[9].mxu0 }
 0x464   :  { %v510_v17 = vmul.f32 %v495_v15, %v5179_v34 }
 0x465   :  { %v517_v18 = vadd.f32 %v515_v8, %v511_v14 }
 0x466   :  { %v516_v19 = vadd.f32 %v514_v12, %v510_v17 }
 0x468   :  { %4453 = vmatprep.mubr.msk.f32.mxu0 %vm51_vm1, %v516_v19 }
 0x469   :  { %4454 = vmatmul.mubr.msk.f32.vlgmr.msra.gmra.mrb[10].mxu0 %vm51_vm1, %v517_v18 }
 0x46a   :  { %4462 = vmatpush3.msra.mxu0 %v690_v50  ;;  %4463 = vmatprep.mubr.msk.f32.mxu0 %vm51_vm1, %v5293_v20 }
 0x46d   :  { %4464 = vmatmul.mubr.msk.f32.vlgmr.msra.gmra.mrb[12].mxu0 %vm51_vm1, %v5301_v22 }
 0x53c   :  { %v4455_v27 = vpop.f32.mrb[10].mxu0 }
 0x53d   :  { %v599_v28 = vadd.f32 %v4455_v27, %v520_v24  ;;  %v593_v31 = vpop.f32.mrb[11].mxu0 }
 0x53e   :  { %v594_v32 = vadd.f32 %v593_v31, %v519_v3 }
 0x53f   :  { %v5328_v43 = vadd.f32 %v599_v28, %v5111_v10 }
 0x540   :  { %v5325_v38 = vadd.f32 %v594_v32, %v5109_v9  ;;  %v4465_v41 = vpop.f32.mrb[12].mxu0 }
 0x541   :  { %v771_v44 = vadd.f32 %v4465_v41, %v692_v35  ;;  %v765_v46 = vpop.f32.mrb[13].mxu0 }
 0x542   :  { %v766_v47 = vadd.f32 %v765_v46, %v691_v36  ;;  %4458 = vmatprep.mubr.msk.f32.mxu1 %vm51_vm1, %v5325_v38 }
 0x543   :  { %4459 = vmatmul.mubr.msk.f32.vlgmr.msra.gmra.mrb[8].mxu1 %vm51_vm1, %v5328_v43  ;;  %v775_v52 = vmul.f32 %v771_v44, %v5147_v25  ;;  %v777_v55 = vmul.f32 %v771_v44, %v5159_v29  ;;  %v779_v57 = vmul.f32 %v771_v44, %v5173_v33  ;;  %v781_v60 = vmul.f32 %v771_v44, %v5187_v37 }
 0x544   :  { %v5334_v51 = vpack.i.bf16 %v771_v44, %v766_v47  ;;  %v774_v42 = vmul.f32 %v766_v47, %v5126_v16  ;;  %v776_v53 = vmul.f32 %v766_v47, %v5152_v26  ;;  %v778_v56 = vmul.f32 %v766_v47, %v5165_v30 }
 0x545   :  { %v780_v58 = vmul.f32 %v766_v47, %v5179_v34 }
 0x546   :  { %4781 = vrot.lane.b32.xlu0 %v5334_v51, %s5067_s25  ;;  %4470 = vmatprep.mubr.msk.f32.mxu1 %vm51_vm1, %v774_v42 }
 0x5b8   :  { %v4782_v9 = vpop.permute.xlu0 %4781 }
 0x5b9   :  { %v4784_v10 = vunpack.i.h.bf16 %v4782_v9  ;;  %v4783_v49 = vunpack.i.l.bf16 %v4782_v9 }
 0x5bb   :  { %v4716_v50 = vpack.c.bf16 %v4784_v10, %v4783_v49 }
 0x5bd   :  { %4718 = vmatprep.subr.msk.bf16.mxu1 %vm5136_vm2, %v4716_v50 }
 0x5be   :  { %4721 = vmatpush3.bf16.xpose.msk.msra.mxu1 %vm5136_vm2, %v4716_v50 }
 0x5c5   :  { %4471 = vmatmul.mubr.msk.f32.vlgmr.msra.gmra.mrb[10].mxu1 %vm51_vm1, %v775_v52 }
 0x5c6   :  { %4473 = vmatprep.mubr.msk.f32.mxu1 %vm51_vm1, %v776_v53 }
 0x5c9   :  { %4474 = vmatmul.mubr.msk.f32.gmra.mrb[12].mxu1 %vm51_vm1, %v777_v55 }
 0x5ca   :  { %4476 = vmatprep.mubr.msk.f32.mxu1 %vm51_vm1, %v778_v56 }
 0x5cd   :  { %4477 = vmatmul.mubr.msk.f32.gmra.mrb[14].mxu1 %vm51_vm1, %v779_v57 }
 0x5ce   :  { %4479 = vmatprep.mubr.msk.f32.mxu1 %vm51_vm1, %v780_v58 }
 0x5d1   :  { %4480 = vmatmul.mubr.msk.f32.gmra.mrb[16].mxu1 %vm51_vm1, %v781_v60 }
 0x616   :  { %v5358_v61 = vpop.f32.mrb[8].mxu1 }
 0x617   :  { %v5360_v62 = vpop.f32.mrb[9].mxu1 }
 0x698   :  { %v4472_v63 = vpop.f32.mrb[10].mxu1 }
 0x699   :  { %v888_v2 = vadd.f32 %v4472_v63, %v5196_v39  ;;  %v882_v4 = vpop.f32.mrb[11].mxu1 }
 0x69a   :  { %v883_v6 = vadd.f32 %v882_v4, %v5201_v40 }
 0x69b   :  { %v924_v7 = vsel %vm280_vm3, %v888_v2, -inf }
 0x69c   :  { %925 = vmax.xlane.f32.xlu0 %v924_v7  ;;  %v4475_v8 = vpop.f32.mrb[12].mxu1  ;;  %v921_v11 = vsel %vm280_vm3, %v883_v6, -inf }
 0x69d   :  { %v898_v12 = vadd.f32 %v4475_v8, %v5208_v45  ;;  %v892_v13 = vpop.f32.mrb[13].mxu1  ;;  %922 = vmax.xlane.f32.xlu1 %v921_v11 }
 0x69e   :  { %v893_v14 = vadd.f32 %v892_v13, %v5214_v48 }
 0x69f   :  { %v930_v15 = vsel %vm280_vm3, %v898_v12, -inf }
 0x6a0   :  { %v4478_v17 = vpop.f32.mrb[14].mxu1  ;;  %v927_v18 = vsel %vm280_vm3, %v893_v14, -inf }
 0x6a1   :  { %v908_v19 = vadd.f32 %v4478_v17, %v5223_v54  ;;  %v902_v21 = vpop.f32.mrb[15].mxu1  ;;  %928 = vmax.xlane.f32.xlu0 %v927_v18  ;;  %931 = vmax.xlane.f32.xlu1 %v930_v15 }
 0x6a2   :  { %v903_v24 = vadd.f32 %v902_v21, %v5230_v59 }
 0x6a3   :  { %v936_v3 = vsel %vm280_vm3, %v908_v19, -inf }
 0x6a4   :  { %v4481_v27 = vpop.f32.mrb[16].mxu1  ;;  %v933_v28 = vsel %vm280_vm3, %v903_v24, -inf }
 0x6a5   :  { %v918_v31 = vadd.f32 %v4481_v27, %v5244_v5  ;;  %v912_v32 = vpop.f32.mrb[17].mxu1  ;;  %934 = vmax.xlane.f32.xlu0 %v933_v28  ;;  %937 = vmax.xlane.f32.xlu1 %v936_v3 }
 0x6a6   :  { %v913_v35 = vadd.f32 %v912_v32, %v5237_v0 }
 0x6a7   :  { %v942_v36 = vsel %vm280_vm3, %v918_v31, -inf }
 0x6a8   :  { %v939_v41 = vsel %vm280_vm3, %v913_v35, -inf }
 0x6a9   :  { %940 = vmax.xlane.f32.xlu0 %v939_v41  ;;  %943 = vmax.xlane.f32.xlu1 %v942_v36 }
 0x729   :  { %v926_v44 = vpop.xlane.xlu0 %925 }
 0x72a   :  { %v946_v46 = vsub.f32 %v888_v2, %v926_v44  ;;  %v923_v47 = vpop.xlane.xlu1 %922 }
 0x72b   :  { %v945_v42 = vsub.f32 %v883_v6, %v923_v47 }
 0x72c   :  { %v955_v9 = vmul.f32 1.442695, %v946_v46 }
 0x72d   :  { %v953_v10 = vmul.f32 1.442695, %v945_v42 }
 0x72e   :  { %4852 = vpow2.f32 %v955_v9  ;;  %v929_v49 = vpop.xlane.xlu0 %928  ;;  %v932_v50 = vpop.xlane.xlu1 %931 }
 0x72f   :  { %4854 = vpow2.f32 %v953_v10  ;;  %v947_v52 = vsub.f32 %v893_v14, %v929_v49  ;;  %v948_v53 = vsub.f32 %v898_v12, %v932_v50 }
 0x731   :  { %v957_v55 = vmul.f32 1.442695, %v947_v52  ;;  %v959_v56 = vmul.f32 1.442695, %v948_v53 }
 0x732   :  { %v935_v57 = vpop.xlane.xlu0 %934  ;;  %v938_v58 = vpop.xlane.xlu1 %937 }
 0x733   :  { %4856 = vpow2.f32 %v957_v55  ;;  %v949_v60 = vsub.f32 %v903_v24, %v935_v57  ;;  %v950_v63 = vsub.f32 %v908_v19, %v938_v58 }
 0x734   :  { %4858 = vpow2.f32 %v959_v56 }
 0x735   :  { %v961_v4 = vmul.f32 1.442695, %v949_v60  ;;  %v963_v2 = vmul.f32 1.442695, %v950_v63 }
 0x736   :  { %v941_v7 = vpop.xlane.xlu0 %940  ;;  %v944_v6 = vpop.xlane.xlu1 %943 }
 0x737   :  { %4860 = vpow2.f32 %v961_v4  ;;  %v951_v8 = vsub.f32 %v913_v35, %v941_v7  ;;  %v952_v11 = vsub.f32 %v918_v31, %v944_v6 }
 0x738   :  { %v4853_v13 = vpop.eup %4852  ;;  %4862 = vpow2.f32 %v963_v2 }
 0x739   :  { %v4855_v15 = vpop.eup %4854  ;;  %v965_v14 = vmul.f32 1.442695, %v951_v8  ;;  %v967_v12 = vmul.f32 1.442695, %v952_v11  ;;  %v972_v17 = vsel %vm280_vm3, %v4853_v13, 0.0 }
 0x73a   :  { %973 = vadd.xlane.f32.xlu1 %v972_v17  ;;  %v969_v18 = vsel %vm280_vm3, %v4855_v15, 0.0 }
 0x73b   :  { %4864 = vpow2.f32 %v965_v14  ;;  %970 = vadd.xlane.f32.xlu0 %v969_v18 }
 0x73c   :  { %4866 = vpow2.f32 %v967_v12 }
 0x73d   :  { %v4857_v19 = vpop.eup %4856 }
 0x73e   :  { %v4859_v21 = vpop.eup %4858  ;;  %v975_v24 = vsel %vm280_vm3, %v4857_v19, 0.0 }
 0x73f   :  { %976 = vadd.xlane.f32.xlu0 %v975_v24  ;;  %v978_v3 = vsel %vm280_vm3, %v4859_v21, 0.0  ;;  %v1244_v24 = vld [vmem:[%s6077_s1 + $0x108] sm:$0xff] }
 0x740   :  { %979 = vadd.xlane.f32.xlu1 %v978_v3  ;;  %4503 = vmatprep.subr.mxu1 %v1244_v24 }
 0x741   :  { %v4861_v27 = vpop.eup %4860  ;;  %4504 = vmatpush3.msra.mxu1 %v1244_v24 }
 0x742   :  { %v4863_v28 = vpop.eup %4862  ;;  %v981_v31 = vsel %vm280_vm3, %v4861_v27, 0.0 }
 0x743   :  { %982 = vadd.xlane.f32.xlu0 %v981_v31  ;;  %v984_v32 = vsel %vm280_vm3, %v4863_v28, 0.0 }
 0x744   :  { %985 = vadd.xlane.f32.xlu1 %v984_v32 }
 0x745   :  { %v4865_v35 = vpop.eup %4864 }
 0x746   :  { %v4867_v36 = vpop.eup %4866  ;;  %v987_v41 = vsel %vm280_vm3, %v4865_v35, 0.0 }
 0x747   :  { %988 = vadd.xlane.f32.xlu0 %v987_v41  ;;  %v990_v44 = vsel %vm280_vm3, %v4867_v36, 0.0 }
 0x748   :  { %991 = vadd.xlane.f32.xlu1 %v990_v44 }
 0x75d   :  { %4786 = vrot.lane.b32.xlu0 %v5334_v51, %s5068_s29 }
 0x7c7   :  { %v974_v47 = vpop.xlane.xlu1 %973 }
 0x7c8   :  { %v971_v46 = vpop.xlane.xlu0 %970 }
 0x7c9   :  { %4868 = vrcp.f32 %v971_v46 }
 0x7ca   :  { %4870 = vrcp.f32 %v974_v47 }
 0x7cc   :  { %v977_v42 = vpop.xlane.xlu0 %976 }
 0x7cd   :  { %v980_v9 = vpop.xlane.xlu1 %979  ;;  %4872 = vrcp.f32 %v977_v42 }
 0x7ce   :  { %4874 = vrcp.f32 %v980_v9 }
 0x7d0   :  { %v983_v10 = vpop.xlane.xlu0 %982 }
 0x7d1   :  { %v986_v53 = vpop.xlane.xlu1 %985  ;;  %4876 = vrcp.f32 %v983_v10 }
 0x7d2   :  { %4878 = vrcp.f32 %v986_v53 }
 0x7d3   :  { %v4869_v49 = vpop.eup %4868 }
 0x7d4   :  { %v989_v50 = vpop.xlane.xlu0 %988  ;;  %v1001_v52 = vmul.f32 %v4869_v49, %v4855_v15  ;;  %v4871_v60 = vpop.eup %4870  ;;  %v605_v49 = vld [vmem:[%s6077_s1 + $0xc8] sm:$0xff] }
 0x7d5   :  { %4880 = vrcp.f32 %v989_v50  ;;  %v992_v51 = vpop.xlane.xlu1 %991  ;;  %v1002_v4 = vmul.f32 %v4871_v60, %v4853_v13 }
 0x7d6   :  { %4486 = vmatprep.mubr.msk.f32.mxu0 %vm280_vm3, %v1001_v52  ;;  %4882 = vrcp.f32 %v992_v51  ;;  %v680_v51 = vadd.f32 %v5360_v62, %v605_v49  ;;  %v1160_v62 = vld [vmem:[%s6077_s1 + $0x100] sm:$0xff] }
 0x7d7   :  { %v4873_v63 = vpop.eup %4872 }
 0x7d8   :  { %v4787_v55 = vpop.permute.xlu0 %4786  ;;  %v4875_v2 = vpop.eup %4874  ;;  %v1003_v7 = vmul.f32 %v4873_v63, %v4857_v19  ;;  %v1158_v19 = vld [vmem:[%s6077_s1 + $0xf0] sm:$0xff] }
 0x7d9   :  { %v4789_v56 = vunpack.i.h.bf16 %v4787_v55  ;;  %v4788_v57 = vunpack.i.l.bf16 %v4787_v55  ;;  %v1004_v8 = vmul.f32 %v4875_v2, %v4859_v21  ;;  %v1328_v21 = vld [vmem:[%s6077_s1 + $0x120] sm:$0xff]  ;;  %v688_v2 = vadd.f32 %v680_v51, %v5325_v38 }
 0x7db   :  { %v4722_v58 = vpack.c.bf16 %v4789_v56, %v4788_v57  ;;  %v4877_v6 = vpop.eup %4876  ;;  %v606_v57 = vld [vmem:[%s6077_s1 + $0xd0] sm:$0xff] }
 0x7dc   :  { %v4879_v11 = vpop.eup %4878  ;;  %v1005_v15 = vmul.f32 %v4877_v6, %v4861_v27 }
 0x7dd   :  { %4723 = vmatprep.subr.bf16.mxu0 %v4722_v58  ;;  %v1006_v12 = vmul.f32 %v4879_v11, %v4863_v28 }
 0x7de   :  { %4725 = vmatpush3.bf16.msra.mxu0 %v4722_v58 }
 0x7df   :  { %v4881_v14 = vpop.eup %4880  ;;  %4498 = vmatprep.subr.mxu0 %v1158_v19 }
 0x7e0   :  { %v4883_v17 = vpop.eup %4882  ;;  %v1007_v18 = vmul.f32 %v4881_v14, %v4865_v35 }
 0x7e1   :  { %4487 = vmatmul.mubr.msk.f32.vlgmr.msra.gmra.mrb[14].mxu0 %vm280_vm3, %v1002_v4  ;;  %v1008_v13 = vmul.f32 %v4883_v17, %v4867_v36  ;;  %v685_v4 = vadd.f32 %v5358_v61, %v606_v57  ;;  %v1159_v61 = vld [vmem:[%s6077_s1 + $0xf8] sm:$0xff] }
 0x7e2   :  { %4489 = vmatprep.mubr.msk.f32.mxu0 %vm280_vm3, %v1003_v7  ;;  %4499 = vmatpush3.msra.mxu0 %v1158_v19 }
 0x7e3   :  { %4508 = vmatprep.subr.mxu0 %v1328_v21  ;;  %v689_v7 = vadd.f32 %v685_v4, %v5328_v43  ;;  %v1329_v43 = vld [vmem:[%s6077_s1 + $0x128] sm:$0xff] }
 0x7e5   :  { %4490 = vmatmul.mubr.msk.f32.gmra.mrb[16].mxu0 %vm280_vm3, %v1004_v8 }
 0x7e6   :  { %4492 = vmatprep.mubr.msk.f32.mxu0 %vm280_vm3, %v1005_v15  ;;  %v1330_v15 = vld [vmem:[%s6077_s1 + $0x130] sm:$0xff] }
 0x7e9   :  { %4493 = vmatmul.mubr.msk.f32.gmra.mrb[18].mxu0 %vm280_vm3, %v1006_v12 }
 0x7ea   :  { %4495 = vmatprep.mubr.msk.f32.mxu0 %vm280_vm3, %v1007_v18 }
 0x7ed   :  { %4496 = vmatmul.mubr.msk.f32.gmra.mrb[20].mxu0 %vm280_vm3, %v1008_v13 }
 0x8b4   :  { %v4488_v3 = vpop.f32.mrb[14].mxu0 }
 0x8b5   :  { %v1105_v27 = vpop.f32.mrb[15].mxu0  ;;  %v1145_v31 = vmul.f32 %v4488_v3, %v5147_v25  ;;  %v1246_v3 = vld [vmem:[%s6077_s1 + $0x118] sm:$0xff] }
 0x8b6   :  { %v1144_v36 = vmul.f32 %v1105_v27, %v5126_v16  ;;  %v1245_v27 = vld [vmem:[%s6077_s1 + $0x110] sm:$0xff] }
 0x8b8   :  { %v4491_v28 = vpop.f32.mrb[16].mxu0 }
 0x8b9   :  { %v1147_v32 = vmul.f32 %v4491_v28, %v5159_v29  ;;  %v1115_v35 = vpop.f32.mrb[17].mxu0 }
 0x8ba   :  { %v1146_v41 = vmul.f32 %v1115_v35, %v5152_v26 }
 0x8bb   :  { %v1153_v44 = vadd.f32 %v1147_v32, %v1145_v31 }
 0x8bc   :  { %v1152_v46 = vadd.f32 %v1146_v41, %v1144_v36  ;;  %v4494_v47 = vpop.f32.mrb[18].mxu0 }
 0x8bd   :  { %v1149_v42 = vmul.f32 %v4494_v47, %v5173_v33  ;;  %v1125_v9 = vpop.f32.mrb[19].mxu0 }
 0x8be   :  { %v1148_v10 = vmul.f32 %v1125_v9, %v5165_v30 }
 0x8bf   :  { %v1155_v50 = vadd.f32 %v1153_v44, %v1149_v42 }
 0x8c0   :  { %v1154_v52 = vadd.f32 %v1152_v46, %v1148_v10  ;;  %v4497_v53 = vpop.f32.mrb[20].mxu0 }
 0x8c1   :  { %v1151_v55 = vmul.f32 %v4497_v53, %v5187_v37  ;;  %v1135_v56 = vpop.f32.mrb[21].mxu0 }
 0x8c2   :  { %v1150_v58 = vmul.f32 %v1135_v56, %v5179_v34 }
 0x8c3   :  { %v1157_v60 = vadd.f32 %v1155_v50, %v1151_v55 }
 0x8c4   :  { %v1156_v63 = vadd.f32 %v1154_v52, %v1150_v58 }
 0x8c6   :  { %4500 = vmatprep.mubr.msk.f32.mxu0 %vm51_vm1, %v1156_v63 }
 0x8c7   :  { %4501 = vmatmul.mubr.msk.f32.vlgmr.msra.gmra.mrb[22].mxu0 %vm51_vm1, %v1157_v60 }
 0x8c8   :  { %4510 = vmatprep.mubr.msk.f32.mxu0 %vm51_vm1, %v688_v2  ;;  %4509 = vmatpush3.msra.mxu0 %v1328_v21 }
 0x8cb   :  { %4511 = vmatmul.mubr.msk.f32.vlgmr.msra.gmra.mrb[24].mxu0 %vm51_vm1, %v689_v7 }
 0x99a   :  { %v4502_v38 = vpop.f32.mrb[22].mxu0 }
 0x99b   :  { %v1239_v6 = vadd.f32 %v4502_v38, %v1160_v62  ;;  %v1233_v8 = vpop.f32.mrb[23].mxu0 }
 0x99c   :  { %v1234_v11 = vadd.f32 %v1233_v8, %v1159_v61 }
 0x99d   :  { %v5443_v17 = vadd.f32 %v1239_v6, %v5301_v22 }
 0x99e   :  { %v5440_v14 = vadd.f32 %v1234_v11, %v5293_v20  ;;  %v4512_v12 = vpop.f32.mrb[24].mxu0 }
 0x99f   :  { %v5445_v18 = vadd.f32 %v4512_v12, %v1330_v15  ;;  %v1403_v13 = vpop.f32.mrb[25].mxu0 }
 0x9a0   :  { %v5447_v19 = vadd.f32 %v1403_v13, %v1329_v43  ;;  %4505 = vmatprep.mubr.msk.f32.mxu1 %vm51_vm1, %v5440_v14 }
 0x9a1   :  { %4506 = vmatmul.mubr.msk.f32.vlgmr.msra.gmra.mrb[18].mxu1 %vm51_vm1, %v5443_v17 }
 0x9a2   :  { %v4790_v21 = vpack.i.bf16 %v5445_v18, %v5447_v19  ;;  %v4726_v24 = vpack.c.bf16 %v5445_v18, %v5447_v19 }
 0x9a4   :  { %4728 = vmatprep.subr.msk.bf16.mxu1 %vm5136_vm2, %v4726_v24 }
 0x9a5   :  { %4731 = vmatpush3.bf16.xpose.msk.msra.mxu1 %vm5136_vm2, %v4726_v24 }
 0xa74   :  { %v4507_v28 = vpop.f32.mrb[18].mxu1 }
 0xa75   :  { %v1325_v31 = vadd.f32 %v4507_v28, %v1246_v3  ;;  %v1319_v32 = vpop.f32.mrb[19].mxu1 }
 0xa76   :  { %v1320_v35 = vadd.f32 %v1319_v32, %v1245_v27 }
 0xa77   :  { %v1413_v41 = vmul.f32 %v1325_v31, %v5147_v25  ;;  %v1415_v46 = vmul.f32 %v1325_v31, %v5159_v29 }
 0xa78   :  { %v1412_v36 = vmul.f32 %v1320_v35, %v5126_v16  ;;  %v1414_v44 = vmul.f32 %v1320_v35, %v5152_v26  ;;  %v1416_v47 = vmul.f32 %v1320_v35, %v5165_v30  ;;  %v1417_v16 = vmul.f32 %v1325_v31, %v5173_v33 }
 0xa79   :  { %v1418_v25 = vmul.f32 %v1320_v35, %v5179_v34  ;;  %v1419_v26 = vmul.f32 %v1325_v31, %v5187_v37 }
 0xa7a   :  { %4517 = vmatprep.mubr.msk.f32.mxu1 %vm51_vm1, %v1412_v36 }
 0xa7b   :  { %4518 = vmatmul.mubr.msk.f32.vlgmr.msra.gmra.mrb[20].mxu1 %vm51_vm1, %v1413_v41 }
 0xa7c   :  { %4520 = vmatprep.mubr.msk.f32.mxu1 %vm51_vm1, %v1414_v44 }
 0xa7f   :  { %4521 = vmatmul.mubr.msk.f32.gmra.mrb[22].mxu1 %vm51_vm1, %v1415_v46 }
 0xa80   :  { %4523 = vmatprep.mubr.msk.f32.mxu1 %vm51_vm1, %v1416_v47 }
 0xa83   :  { %4524 = vmatmul.mubr.msk.f32.gmra.mrb[24].mxu1 %vm51_vm1, %v1417_v16 }
 0xa84   :  { %4526 = vmatprep.mubr.msk.f32.mxu1 %vm51_vm1, %v1418_v25 }
 0xa87   :  { %4527 = vmatmul.mubr.msk.f32.gmra.mrb[26].mxu1 %vm51_vm1, %v1419_v26 }
 0xb4e   :  { %v4519_v42 = vpop.f32.mrb[20].mxu1 }
 0xb4f   :  { %v1522_v29 = vadd.f32 %v4519_v42, %v5196_v39  ;;  %v1516_v30 = vpop.f32.mrb[21].mxu1 }
 0xb50   :  { %v1517_v9 = vadd.f32 %v1516_v30, %v5201_v40 }
 0xb51   :  { %v1558_v10 = vsel %vm280_vm3, %v1522_v29, -inf }
 0xb52   :  { %1559 = vmax.xlane.f32.xlu1 %v1558_v10  ;;  %v4522_v33 = vpop.f32.mrb[22].mxu1  ;;  %v1555_v50 = vsel %vm280_vm3, %v1517_v9, -inf }
 0xb53   :  { %v1526_v49 = vpop.f32.mrb[23].mxu1  ;;  %v1532_v34 = vadd.f32 %v4522_v33, %v5208_v45 }
 0xb54   :  { %v1527_v53 = vadd.f32 %v1526_v49, %v5214_v48 }
 0xb55   :  { %v1564_v55 = vsel %vm280_vm3, %v1532_v34, -inf }
 0xb56   :  { %v4525_v52 = vpop.f32.mrb[24].mxu1  ;;  %1556 = vmax.xlane.f32.xlu1 %v1555_v50  ;;  %v1561_v51 = vsel %vm280_vm3, %v1527_v53, -inf }
 0xb57   :  { %v1536_v37 = vpop.f32.mrb[25].mxu1  ;;  %v1542_v58 = vadd.f32 %v4525_v52, %v5223_v54 }
 0xb58   :  { %v1537_v57 = vadd.f32 %v1536_v37, %v5230_v59 }
 0xb59   :  { %v1570_v63 = vsel %vm280_vm3, %v1542_v58, -inf }
 0xb5a   :  { %v4528_v39 = vpop.f32.mrb[26].mxu1  ;;  %1565 = vmax.xlane.f32.xlu1 %v1564_v55  ;;  %v1567_v60 = vsel %vm280_vm3, %v1537_v57, -inf }
 0xb5b   :  { %v1546_v56 = vpop.f32.mrb[27].mxu1  ;;  %v1552_v48 = vadd.f32 %v4528_v39, %v5244_v5 }
 0xb5c   :  { %v1547_v40 = vadd.f32 %v1546_v56, %v5237_v0 }
 0xb5d   :  { %v1576_v0 = vsel %vm280_vm3, %v1552_v48, -inf }
 0xb5e   :  { %1562 = vmax.xlane.f32.xlu1 %v1561_v51  ;;  %v1573_v45 = vsel %vm280_vm3, %v1547_v40, -inf }
 0xb5f   :  { %1574 = vmax.xlane.f32.xlu0 %v1573_v45 }
 0xb62   :  { %1568 = vmax.xlane.f32.xlu1 %v1567_v60 }
 0xb66   :  { %1571 = vmax.xlane.f32.xlu1 %v1570_v63 }
 0xb6a   :  { %1577 = vmax.xlane.f32.xlu1 %v1576_v0 }
 0xbdf   :  { %v1560_v59 = vpop.xlane.xlu1 %1559 }
 0xbe0   :  { %v1580_v4 = vsub.f32 %v1522_v29, %v1560_v59 }
 0xbe2   :  { %v1589_v2 = vmul.f32 1.442695, %v1580_v4 }
 0xbe3   :  { %v1557_v7 = vpop.xlane.xlu1 %1556 }
 0xbe4   :  { %4884 = vpow2.f32 %v1589_v2  ;;  %v1579_v62 = vsub.f32 %v1517_v9, %v1557_v7 }
 0xbe6   :  { %v1587_v61 = vmul.f32 1.442695, %v1579_v62 }
 0xbe7   :  { %v1566_v38 = vpop.xlane.xlu1 %1565 }
 0xbe8   :  { %4886 = vpow2.f32 %v1587_v61  ;;  %v1582_v54 = vsub.f32 %v1532_v34, %v1566_v38 }
 0xbea   :  { %v1593_v6 = vmul.f32 1.442695, %v1582_v54 }
 0xbeb   :  { %v1563_v8 = vpop.xlane.xlu1 %1562 }
 0xbec   :  { %4888 = vpow2.f32 %v1593_v6  ;;  %v1581_v5 = vsub.f32 %v1527_v53, %v1563_v8  ;;  %v1575_v11 = vpop.xlane.xlu0 %1574 }
 0xbed   :  { %v1585_v15 = vsub.f32 %v1547_v40, %v1575_v11  ;;  %v1878_v11 = vld [vmem:[%s6077_s1 + $0x150] sm:$0xff] }
 0xbee   :  { %v5499_v43 = vpop.eup %4884  ;;  %v1591_v12 = vmul.f32 1.442695, %v1581_v5  ;;  %v1792_v5 = vld [vmem:[%s6077_s1 + $0x138] sm:$0xff]  ;;  %4550 = vmatprep.subr.mxu1 %v1878_v11 }
 0xbef   :  { %v1599_v13 = vmul.f32 1.442695, %v1585_v15  ;;  %v1569_v24 = vpop.xlane.xlu1 %1568  ;;  %v1606_v3 = vsel %vm280_vm3, %v5499_v43, 0.0  ;;  %4551 = vmatpush3.msra.mxu1 %v1878_v11  ;;  %v5028_v15 = vld [vmem:[%s6077_s1 + $0x90] sm:$0xff] }
 0xbf0   :  { %4890 = vpow2.f32 %v1591_v12  ;;  %v1583_v27 = vsub.f32 %v1537_v57, %v1569_v24  ;;  %1607 = vadd.xlane.f32.xlu1 %v1606_v3  ;;  %4560 = vmatprep.subr.mxu1 %v5028_v15  ;;  %v5535_v24 = vld [vmem:[%s6077_s1 + $0x18] sm:$0xff] }
 0xbf1   :  { %4892 = vpow2.f32 %v1599_v13 }
 0xbf2   :  { %v4887_v28 = vpop.eup %4886  ;;  %v1595_v31 = vmul.f32 1.442695, %v1583_v27  ;;  %v5541_v27 = vld [vmem:[%s6077_s1 + $0x28] sm:$0xff] }
 0xbf3   :  { %v1572_v32 = vpop.xlane.xlu1 %1571  ;;  %v1603_v35 = vsel %vm280_vm3, %v4887_v28, 0.0 }
 0xbf4   :  { %4894 = vpow2.f32 %v1595_v31  ;;  %v1584_v36 = vsub.f32 %v1542_v58, %v1572_v32  ;;  %1604 = vadd.xlane.f32.xlu1 %v1603_v35  ;;  %v5547_v32 = vld [vmem:[%s6077_s1 + $0x10] sm:$0xff] }
 0xbf6   :  { %v4889_v41 = vpop.eup %4888  ;;  %v1597_v44 = vmul.f32 1.442695, %v1584_v36  ;;  %v5553_v36 = vld [vmem:[%s6077_s1 + $0x20] sm:$0xff] }
 0xbf7   :  { %v1578_v46 = vpop.xlane.xlu1 %1577  ;;  %v1612_v47 = vsel %vm280_vm3, %v4889_v41, 0.0 }
 0xbf8   :  { %4896 = vpow2.f32 %v1597_v44  ;;  %v1586_v16 = vsub.f32 %v1552_v48, %v1578_v46  ;;  %1613 = vadd.xlane.f32.xlu1 %v1612_v47 }
 0xbfa   :  { %v4891_v25 = vpop.eup %4890  ;;  %v1601_v26 = vmul.f32 1.442695, %v1586_v16  ;;  %v5559_v16 = vld [vmem:[%s6077_s1 + $0x38] sm:$0xff] }
 0xbfb   :  { %v4893_v42 = vpop.eup %4892  ;;  %v1609_v29 = vsel %vm280_vm3, %v4891_v25, 0.0 }
 0xbfc   :  { %4898 = vpow2.f32 %v1601_v26  ;;  %1610 = vadd.xlane.f32.xlu1 %v1609_v29  ;;  %v1621_v30 = vsel %vm280_vm3, %v4893_v42, 0.0 }
 0xbfd   :  { %1622 = vadd.xlane.f32.xlu0 %v1621_v30 }
 0xbfe   :  { %v4895_v9 = vpop.eup %4894 }
 0xbff   :  { %v1615_v10 = vsel %vm280_vm3, %v4895_v9, 0.0 }
 0xc00   :  { %1616 = vadd.xlane.f32.xlu1 %v1615_v10 }
 0xc02   :  { %v4897_v33 = vpop.eup %4896 }
 0xc03   :  { %v1618_v49 = vsel %vm280_vm3, %v4897_v33, 0.0 }
 0xc04   :  { %1619 = vadd.xlane.f32.xlu1 %v1618_v49 }
 0xc06   :  { %v4899_v34 = vpop.eup %4898 }
 0xc07   :  { %v1624_v50 = vsel %vm280_vm3, %v4899_v34, 0.0 }
 0xc08   :  { %1625 = vadd.xlane.f32.xlu1 %v1624_v50  ;;  %v5577_v50 = vld [vmem:[%s6077_s1 + $0x40] sm:$0xff] }
 0xc13   :  { %4791 = vrot.lane.b32.xlu0 %v4790_v21, %s5067_s25 }
 0xc7d   :  { %v1608_v52 = vpop.xlane.xlu1 %1607 }
 0xc81   :  { %v1605_v37 = vpop.xlane.xlu1 %1604 }
 0xc82   :  { %4900 = vrcp.f32 %v1605_v37 }
 0xc83   :  { %4902 = vrcp.f32 %v1608_v52 }
 0xc85   :  { %v1614_v53 = vpop.xlane.xlu1 %1613 }
 0xc89   :  { %v1611_v55 = vpop.xlane.xlu1 %1610 }
 0xc8a   :  { %4904 = vrcp.f32 %v1611_v55  ;;  %v1623_v39 = vpop.xlane.xlu0 %1622  ;;  %v1794_v55 = vld [vmem:[%s6077_s1 + $0x148] sm:$0xff] }
 0xc8b   :  { %4906 = vrcp.f32 %v1614_v53 }
 0xc8c   :  { %v4901_v56 = vpop.eup %4900 }
 0xc8d   :  { %v1617_v40 = vpop.xlane.xlu1 %1616  ;;  %v1635_v57 = vmul.f32 %v4901_v56, %v4887_v28  ;;  %v4903_v21 = vpop.eup %4902 }
 0xc8e   :  { %4908 = vrcp.f32 %v1617_v40  ;;  %v4792_v51 = vpop.permute.xlu0 %4791  ;;  %v1636_v48 = vmul.f32 %v4903_v21, %v5499_v43 }
 0xc8f   :  { %v4794_v45 = vunpack.i.h.bf16 %v4792_v51  ;;  %v4793_v58 = vunpack.i.l.bf16 %v4792_v51  ;;  %4533 = vmatprep.mubr.msk.f32.mxu0 %vm280_vm3, %v1635_v57  ;;  %4910 = vrcp.f32 %v1623_v39  ;;  %v1793_v39 = vld [vmem:[%s6077_s1 + $0x140] sm:$0xff] }
 0xc91   :  { %v4732_v18 = vpack.c.bf16 %v4794_v45, %v4793_v58  ;;  %v1620_v19 = vpop.xlane.xlu1 %1619 }
 0xc92   :  { %4912 = vrcp.f32 %v1620_v19  ;;  %v1880_v19 = vld [vmem:[%s6077_s1 + $0x160] sm:$0xff] }
 0xc93   :  { %4733 = vmatprep.subr.bf16.mxu0 %v4732_v18 }
 0xc94   :  { %v4905_v60 = vpop.eup %4904  ;;  %4735 = vmatpush3.bf16.msra.mxu0 %v4732_v18  ;;  %v1964_v18 = vld [vmem:[%s6077_s1 + $0x1f8] sm:$0xff] }
 0xc95   :  { %v1626_v63 = vpop.xlane.xlu1 %1625  ;;  %v1637_v0 = vmul.f32 %v4905_v60, %v4891_v25  ;;  %v4907_v59 = vpop.eup %4906  ;;  %4545 = vmatprep.subr.mxu0 %v1792_v5 }
 0xc96   :  { %4914 = vrcp.f32 %v1626_v63  ;;  %v1638_v2 = vmul.f32 %v4907_v59, %v4889_v41  ;;  %v1966_v59 = vld [vmem:[%s6077_s1 + $0x208] sm:$0xff] }
 0xc97   :  { %4534 = vmatmul.mubr.msk.f32.vlgmr.msra.gmra.mrb[26].mxu0 %vm280_vm3, %v1636_v48 }
 0xc98   :  { %v4909_v4 = vpop.eup %4908  ;;  %4536 = vmatprep.mubr.msk.f32.mxu0 %vm280_vm3, %v1637_v0  ;;  %4546 = vmatpush3.msra.mxu0 %v1792_v5 }
 0xc99   :  { %v1639_v7 = vmul.f32 %v4909_v4, %v4895_v9  ;;  %v4911_v62 = vpop.eup %4910  ;;  %4555 = vmatprep.subr.mxu0 %v1964_v18  ;;  %v1965_v4 = vld [vmem:[%s6077_s1 + $0x200] sm:$0xff] }
 0xc9a   :  { %v1641_v54 = vmul.f32 %v4911_v62, %v4893_v42  ;;  %v5565_v42 = vld [vmem:[%s6077_s1 + $0x30] sm:$0xff] }
 0xc9b   :  { %4537 = vmatmul.mubr.msk.f32.gmra.mrb[28].mxu0 %vm280_vm3, %v1638_v2 }
 0xc9c   :  { %v4913_v61 = vpop.eup %4912  ;;  %4539 = vmatprep.mubr.msk.f32.mxu0 %vm280_vm3, %v1639_v7 }
 0xc9d   :  { %v1640_v38 = vmul.f32 %v4913_v61, %v4897_v33  ;;  %v5571_v33 = vld [vmem:[%s6077_s1 + $0x48] sm:$0xff] }
 0xc9f   :  { %4540 = vmatmul.mubr.msk.f32.gmra.mrb[30].mxu0 %vm280_vm3, %v1640_v38 }
 0xca0   :  { %v4915_v6 = vpop.eup %4914  ;;  %4542 = vmatprep.mubr.msk.f32.mxu0 %vm280_vm3, %v1641_v54 }
 0xca1   :  { %v1642_v8 = vmul.f32 %v4915_v6, %v4899_v34 }
 0xca3   :  { %4543 = vmatmul.mubr.msk.f32.gmra.mrb[32].mxu0 %vm280_vm3, %v1642_v8 }
 0xd6a   :  { %v4535_v43 = vpop.f32.mrb[26].mxu0 }
 0xd6b   :  { %v1739_v12 = vpop.f32.mrb[27].mxu0  ;;  %v1779_v3 = vmul.f32 %v5535_v24, %v4535_v43 }
 0xd6c   :  { %v1778_v35 = vmul.f32 %v5547_v32, %v1739_v12 }
 0xd6e   :  { %v4538_v13 = vpop.f32.mrb[28].mxu0 }
 0xd6f   :  { %v1781_v28 = vmul.f32 %v5541_v27, %v4538_v13  ;;  %v1749_v31 = vpop.f32.mrb[29].mxu0 }
 0xd70   :  { %v1780_v41 = vmul.f32 %v5553_v36, %v1749_v31 }
 0xd71   :  { %v1787_v44 = vadd.f32 %v1781_v28, %v1779_v3  ;;  %v5037_v3 = vld [vmem:[%s6078_s0] sm:$0xff] }
 0xd72   :  { %v1786_v46 = vadd.f32 %v1780_v41, %v1778_v35  ;;  %v4541_v47 = vpop.f32.mrb[30].mxu0  ;;  %v5038_v35 = vld [vmem:[%s6078_s0 + $0x8] sm:$0xff] }
 0xd73   :  { %v1783_v25 = vmul.f32 %v5559_v16, %v4541_v47  ;;  %v1759_v26 = vpop.f32.mrb[31].mxu0 }
 0xd74   :  { %v1782_v29 = vmul.f32 %v5565_v42, %v1759_v26  ;;  %v5039_v26 = vld [vmem:[%s6077_s1] sm:$0xff] }
 0xd75   :  { %v1789_v30 = vadd.f32 %v1787_v44, %v1783_v25 }
 0xd76   :  { %v1788_v9 = vadd.f32 %v1786_v46, %v1782_v29  ;;  %v4544_v10 = vpop.f32.mrb[32].mxu0 }
 0xd77   :  { %v1785_v49 = vmul.f32 %v5571_v33, %v4544_v10  ;;  %v1769_v34 = vpop.f32.mrb[33].mxu0 }
 0xd78   :  { %v1784_v52 = vmul.f32 %v5577_v50, %v1769_v34 }
 0xd79   :  { %v1791_v37 = vadd.f32 %v1789_v30, %v1785_v49  ;;  %v5040_v49 = vld [vmem:[%s6077_s1 + $0x8] sm:$0xff] }
 0xd7a   :  { %v1790_v53 = vadd.f32 %v1788_v9, %v1784_v52 }
 0xd7c   :  { %4547 = vmatprep.mubr.msk.f32.mxu0 %vm51_vm1, %v1790_v53 }
 0xd7d   :  { %4548 = vmatmul.mubr.msk.f32.vlgmr.msra.gmra.mrb[34].mxu0 %vm51_vm1, %v1791_v37  ;;  %v5041_v37 = vld [vmem:[%s6077_s1 + $0xa0] sm:$0xff] }
 0xd7e   :  { %4556 = vmatpush3.msra.mxu0 %v1964_v18 }
 0xe50   :  { %v4549_v56 = vpop.f32.mrb[34].mxu0 }
 0xe51   :  { %v1873_v40 = vadd.f32 %v4549_v56, %v1794_v55  ;;  %v1867_v57 = vpop.f32.mrb[35].mxu0 }
 0xe52   :  { %v1868_v51 = vadd.f32 %v1867_v57, %v1793_v39  ;;  %v5042_v39 = vld [vmem:[%s6077_s1 + $0x98] sm:$0xff] }
 0xe53   :  { %v1877_v58 = vadd.f32 %v1873_v40, %v5443_v17 }
 0xe54   :  { %v1876_v45 = vadd.f32 %v1868_v51, %v5440_v14  ;;  %v1879_v14 = vld [vmem:[%s6077_s1 + $0x158] sm:$0xff] }
 0xe56   :  { %4552 = vmatprep.mubr.msk.f32.mxu1 %vm51_vm1, %v1876_v45 }
 0xe57   :  { %4553 = vmatmul.mubr.msk.f32.vlgmr.msra.gmra.mrb[28].mxu1 %vm51_vm1, %v1877_v58 }
 0xe58   :  { %4561 = vmatpush3.msra.mxu1 %v5028_v15 }
 0xf2a   :  { %v4554_v17 = vpop.f32.mrb[28].mxu1 }
 0xf2b   :  { %v1959_v21 = vadd.f32 %v4554_v17, %v1880_v19  ;;  %v1953_v60 = vpop.f32.mrb[29].mxu1 }
 0xf2c   :  { %v1954_v48 = vadd.f32 %v1953_v60, %v1879_v14 }
 0xf2d   :  { %v1963_v0 = vadd.f32 %v1959_v21, %v1877_v58 }
 0xf2e   :  { %v1962_v63 = vadd.f32 %v1954_v48, %v1876_v45 }
 0xf30   :  { %4557 = vmatprep.mubr.msk.f32.mxu0 %vm51_vm1, %v1962_v63 }
 0xf31   :  { %4558 = vmatmul.mubr.msk.f32.vlgmr.msra.gmra.mrb[36].mxu0 %vm51_vm1, %v1963_v0  ;;  %v5674_v0 = vld [vmem:[%s6077_s1 + $0x58] sm:$0xff] }
0x1004   :  { %v4559_v2 = vpop.f32.mrb[36].mxu0 }
0x1005   :  { %v2045_v7 = vadd.f32 %v4559_v2, %v1966_v59  ;;  %v2039_v62 = vpop.f32.mrb[37].mxu0  ;;  %v5680_v2 = vld [vmem:[%s6077_s1 + $0x50] sm:$0xff] }
0x1006   :  { %v2040_v61 = vadd.f32 %v2039_v62, %v1965_v4 }
0x1007   :  { %v2049_v38 = vsub.f32 0.0, %v2045_v7 }
0x1008   :  { %v2048_v54 = vsub.f32 0.0, %v2040_v61 }
0x1009   :  { %v2052_v6 = vmul.f32 1.442695, %v2049_v38 }
0x100a   :  { %v2050_v8 = vmul.f32 1.442695, %v2048_v54  ;;  %v5688_v54 = vld [vmem:[%s6077_s1 + $0x68] sm:$0xff] }
0x100b   :  { %4916 = vpow2.f32 %v2052_v6 }
0x100c   :  { %4918 = vpow2.f32 %v2050_v8 }
0x1015   :  { %v4917_v5 = vpop.eup %4916 }
0x1016   :  { %v4919_v11 = vpop.eup %4918  ;;  %v2055_v15 = vadd.f32 1.0, %v4917_v5 }
0x1017   :  { %v2054_v43 = vadd.f32 1.0, %v4919_v11  ;;  %v5695_v11 = vld [vmem:[%s6077_s1 + $0x60] sm:$0xff] }
0x1018   :  { %4920 = vrcp.f32 %v2055_v15 }
0x1019   :  { %4922 = vrcp.f32 %v2054_v43 }
0x1022   :  { %v5609_v12 = vpop.eup %4920 }
0x1023   :  { %v5611_v13 = vpop.eup %4922  ;;  %v2061_v41 = vsub.f32 %v5609_v12, %v5038_v35 }
0x1024   :  { %v2060_v28 = vsub.f32 %v5611_v13, %v5037_v3 }
0x1025   :  { %v2063_v44 = vmul.f32 %v2061_v41, %v2061_v41  ;;  %v5708_v41 = vld [vmem:[%s6077_s1 + $0x70] sm:$0xff] }
0x1026   :  { %v2062_v31 = vmul.f32 %v2060_v28, %v2060_v28 }
0x1028   :  { %2066 = vrot.lane.b32.xlu1 %v2062_v31, %s5070_s28 }
0x102c   :  { %2068 = vrot.lane.b32.xlu1 %v2063_v44, %s5070_s28 }
0x109a   :  { %v2067_v46 = vpop.permute.xlu1 %2066 }
0x109b   :  { %v2072_v47 = vsel %vm39_vm0, %v5037_v3, %v2067_v46  ;;  %v5701_v3 = vld [vmem:[%s6077_s1 + $0x78] sm:$0xff] }
0x109c   :  { %v2074_v25 = vmul.f32 2.0, %v2072_v47 }
0x109e   :  { %v5627_v29 = vadd.f32 %v5039_v26, %v2074_v25  ;;  %v2069_v30 = vpop.permute.xlu1 %2068  ;;  %v5715_v25 = vld [vmem:[%s6077_s1 + $0x88] sm:$0xff] }
0x109f   :  { %v2073_v9 = vsel %vm39_vm0, %v5038_v35, %v2069_v30 }
0x10a0   :  { %v2075_v10 = vmul.f32 2.0, %v2073_v9  ;;  %4562 = vmatprep.mubr.msk.f32.mxu1 %vm51_vm1, %v5627_v29 }
0x10a2   :  { %v5635_v34 = vadd.f32 %v5040_v49, %v2075_v10  ;;  %v5722_v10 = vld [vmem:[%s6077_s1 + $0x80] sm:$0xff] }
0x10a4   :  { %4563 = vmatmul.mubr.msk.f32.vlgmr.msra.gmra.mrb[30].mxu1 %vm51_vm1, %v5635_v34 }
0x1177   :  { %v4564_v52 = vpop.f32.mrb[30].mxu1 }
0x1178   :  { %v2156_v53 = vadd.f32 %v5041_v37, %v4564_v52  ;;  %v2150_v55 = vpop.f32.mrb[31].mxu1 }
0x1179   :  { %v2151_v56 = vadd.f32 %v5042_v39, %v2150_v55 }
0x117a   :  { %v2160_v19 = vmul.f32 %v5535_v24, %v2156_v53  ;;  %v2162_v17 = vmul.f32 %v5541_v27, %v2156_v53  ;;  %v2164_v60 = vmul.f32 %v5559_v16, %v2156_v53  ;;  %v2166_v63 = vmul.f32 %v5571_v33, %v2156_v53 }
0x117b   :  { %v5645_v40 = vpack.i.bf16 %v2156_v53, %v2151_v56  ;;  %v2159_v57 = vmul.f32 %v5547_v32, %v2151_v56  ;;  %v2161_v14 = vmul.f32 %v5553_v36, %v2151_v56  ;;  %v2163_v21 = vmul.f32 %v5565_v42, %v2151_v56 }
0x117c   :  { %v2165_v48 = vmul.f32 %v5577_v50, %v2151_v56 }
0x117d   :  { %4796 = vrot.lane.b32.xlu1 %v5645_v40, %s5067_s25  ;;  %4569 = vmatprep.mubr.msk.f32.mxu0 %vm51_vm1, %v2159_v57 }
0x11ef   :  { %v4797_v51 = vpop.permute.xlu1 %4796 }
0x11f0   :  { %v4799_v45 = vunpack.i.h.bf16 %v4797_v51  ;;  %v4798_v58 = vunpack.i.l.bf16 %v4797_v51 }
0x11f2   :  { %v4736_v18 = vpack.c.bf16 %v4799_v45, %v4798_v58 }
0x11f4   :  { %4738 = vmatprep.subr.msk.bf16.mxu0 %vm5136_vm2, %v4736_v18 }
0x11f5   :  { %4741 = vmatpush3.bf16.xpose.msk.msra.mxu0 %vm5136_vm2, %v4736_v18 }
0x11f6   :  { %4602 = vmatprep.subr.mxu0 %v5308_v1 }
0x11fc   :  { %4570 = vmatmul.mubr.msk.f32.vlgmr.msra.gmra.mrb[38].mxu0 %vm51_vm1, %v2160_v19 }
0x11fd   :  { %4572 = vmatprep.mubr.msk.f32.mxu0 %vm51_vm1, %v2161_v14  ;;  %4603 = vmatpush3.msra.mxu0 %v5308_v1 }
0x1200   :  { %4573 = vmatmul.mubr.msk.f32.gmra.mrb[40].mxu0 %vm51_vm1, %v2162_v17 }
0x1201   :  { %4575 = vmatprep.mubr.msk.f32.mxu0 %vm51_vm1, %v2163_v21 }
0x1204   :  { %4576 = vmatmul.mubr.msk.f32.gmra.mrb[42].mxu0 %vm51_vm1, %v2164_v60 }
0x1205   :  { %4578 = vmatprep.mubr.msk.f32.mxu0 %vm51_vm1, %v2165_v48 }
0x1208   :  { %4579 = vmatmul.mubr.msk.f32.gmra.mrb[44].mxu0 %vm51_vm1, %v2166_v63 }
0x12cf   :  { %v4571_v1 = vpop.f32.mrb[38].mxu0 }
0x12d0   :  { %v2273_v59 = vadd.f32 %v5674_v0, %v4571_v1  ;;  %v2267_v4 = vpop.f32.mrb[39].mxu0 }
0x12d1   :  { %v2268_v7 = vadd.f32 %v5680_v2, %v2267_v4 }
0x12d2   :  { %v2309_v62 = vsel %vm280_vm3, %v2273_v59, -inf }
0x12d3   :  { %2310 = vmax.xlane.f32.xlu1 %v2309_v62  ;;  %v4574_v61 = vpop.f32.mrb[40].mxu0  ;;  %v2306_v38 = vsel %vm280_vm3, %v2268_v7, -inf }
0x12d4   :  { %v2283_v6 = vadd.f32 %v5688_v54, %v4574_v61  ;;  %v2277_v8 = vpop.f32.mrb[41].mxu0  ;;  %2307 = vmax.xlane.f32.xlu0 %v2306_v38 }
0x12d5   :  { %v2278_v15 = vadd.f32 %v5695_v11, %v2277_v8 }
0x12d6   :  { %v2315_v5 = vsel %vm280_vm3, %v2283_v6, -inf }
0x12d7   :  { %v4577_v43 = vpop.f32.mrb[42].mxu0  ;;  %v2312_v47 = vsel %vm280_vm3, %v2278_v15, -inf }
0x12d8   :  { %v2293_v28 = vadd.f32 %v5701_v3, %v4577_v43  ;;  %v2287_v31 = vpop.f32.mrb[43].mxu0  ;;  %2316 = vmax.xlane.f32.xlu0 %v2315_v5 }
0x12d9   :  { %v2288_v44 = vadd.f32 %v5708_v41, %v2287_v31 }
0x12da   :  { %v2321_v35 = vsel %vm280_vm3, %v2293_v28, -inf }
0x12db   :  { %2322 = vmax.xlane.f32.xlu1 %v2321_v35  ;;  %v4580_v46 = vpop.f32.mrb[44].mxu0  ;;  %v2318_v52 = vsel %vm280_vm3, %v2288_v44, -inf }
0x12dc   :  { %v2303_v26 = vadd.f32 %v5715_v25, %v4580_v46  ;;  %v2297_v30 = vpop.f32.mrb[45].mxu0  ;;  %2313 = vmax.xlane.f32.xlu0 %v2312_v47 }
0x12dd   :  { %v2298_v49 = vadd.f32 %v5722_v10, %v2297_v30 }
0x12de   :  { %v2327_v9 = vsel %vm280_vm3, %v2303_v26, -inf }
0x12df   :  { %2328 = vmax.xlane.f32.xlu1 %v2327_v9  ;;  %v2324_v37 = vsel %vm280_vm3, %v2298_v49, -inf }
0x12e0   :  { %2319 = vmax.xlane.f32.xlu0 %v2318_v52 }
0x12e4   :  { %2325 = vmax.xlane.f32.xlu0 %v2324_v37 }
0x1360   :  { %v2311_v53 = vpop.xlane.xlu1 %2310 }
0x1361   :  { %v2331_v55 = vsub.f32 %v2273_v59, %v2311_v53  ;;  %v2308_v39 = vpop.xlane.xlu0 %2307 }
0x1362   :  { %v2330_v56 = vsub.f32 %v2268_v7, %v2308_v39 }
0x1363   :  { %v2340_v57 = vmul.f32 1.442695, %v2331_v55 }
0x1364   :  { %v2338_v51 = vmul.f32 1.442695, %v2330_v56 }
0x1365   :  { %4924 = vpow2.f32 %v2340_v57  ;;  %v2317_v45 = vpop.xlane.xlu0 %2316 }
0x1366   :  { %4926 = vpow2.f32 %v2338_v51  ;;  %v2333_v58 = vsub.f32 %v2283_v6, %v2317_v45 }
0x1368   :  { %v2344_v18 = vmul.f32 1.442695, %v2333_v58  ;;  %v2323_v19 = vpop.xlane.xlu1 %2322 }
0x1369   :  { %v2335_v14 = vsub.f32 %v2293_v28, %v2323_v19  ;;  %v2314_v17 = vpop.xlane.xlu0 %2313 }
0x136a   :  { %4928 = vpow2.f32 %v2344_v18  ;;  %v2332_v21 = vsub.f32 %v2278_v15, %v2314_v17 }
0x136b   :  { %v2348_v60 = vmul.f32 1.442695, %v2335_v14 }
0x136c   :  { %v2342_v48 = vmul.f32 1.442695, %v2332_v21  ;;  %v2329_v63 = vpop.xlane.xlu1 %2328 }
0x136d   :  { %4930 = vpow2.f32 %v2348_v60  ;;  %v2337_v1 = vsub.f32 %v2303_v26, %v2329_v63  ;;  %v2320_v59 = vpop.xlane.xlu0 %2319 }
0x136e   :  { %4932 = vpow2.f32 %v2342_v48  ;;  %v2334_v4 = vsub.f32 %v2288_v44, %v2320_v59 }
0x136f   :  { %v4925_v7 = vpop.eup %4924  ;;  %v2352_v62 = vmul.f32 1.442695, %v2337_v1  ;;  %v5051_v1 = vld [vmem:[%s6077_s1 + $0xa8] sm:$0xff] }
0x1370   :  { %v4927_v61 = vpop.eup %4926  ;;  %v2346_v38 = vmul.f32 1.442695, %v2334_v4  ;;  %v2357_v6 = vsel %vm280_vm3, %v4925_v7, 0.0 }
0x1371   :  { %4934 = vpow2.f32 %v2352_v62  ;;  %2358 = vadd.xlane.f32.xlu1 %v2357_v6  ;;  %v2326_v8 = vpop.xlane.xlu0 %2325  ;;  %v2354_v5 = vsel %vm280_vm3, %v4927_v61, 0.0 }
0x1372   :  { %4936 = vpow2.f32 %v2346_v38  ;;  %v2336_v15 = vsub.f32 %v2298_v49, %v2326_v8  ;;  %2355 = vadd.xlane.f32.xlu0 %v2354_v5 }
0x1374   :  { %v4929_v43 = vpop.eup %4928  ;;  %v2350_v28 = vmul.f32 1.442695, %v2336_v15 }
0x1375   :  { %v2363_v31 = vsel %vm280_vm3, %v4929_v43, 0.0 }
0x1376   :  { %4938 = vpow2.f32 %v2350_v28  ;;  %2364 = vadd.xlane.f32.xlu1 %v2363_v31 }
0x1377   :  { %v4931_v35 = vpop.eup %4930 }
0x1378   :  { %v4933_v44 = vpop.eup %4932  ;;  %v2369_v46 = vsel %vm280_vm3, %v4931_v35, 0.0 }
0x1379   :  { %v2360_v47 = vsel %vm280_vm3, %v4933_v44, 0.0 }
0x137a   :  { %2370 = vadd.xlane.f32.xlu1 %v2369_v46  ;;  %2361 = vadd.xlane.f32.xlu0 %v2360_v47 }
0x137b   :  { %v4935_v26 = vpop.eup %4934 }
0x137c   :  { %v4937_v30 = vpop.eup %4936  ;;  %v2375_v9 = vsel %vm280_vm3, %v4935_v26, 0.0 }
0x137d   :  { %v2366_v49 = vsel %vm280_vm3, %v4937_v30, 0.0 }
0x137e   :  { %2376 = vadd.xlane.f32.xlu1 %v2375_v9  ;;  %2367 = vadd.xlane.f32.xlu0 %v2366_v49 }
0x1380   :  { %v4939_v52 = vpop.eup %4938 }
0x1381   :  { %v2372_v37 = vsel %vm280_vm3, %v4939_v52, 0.0 }
0x1382   :  { %2373 = vadd.xlane.f32.xlu0 %v2372_v37 }
0x1398   :  { %4801 = vrot.lane.b32.xlu0 %v5645_v40, %s5068_s29 }
0x13fe   :  { %v2359_v55 = vpop.xlane.xlu1 %2358 }
0x13ff   :  { %v2356_v53 = vpop.xlane.xlu0 %2355 }
0x1400   :  { %4940 = vrcp.f32 %v2356_v53 }
0x1401   :  { %4942 = vrcp.f32 %v2359_v55 }
0x1403   :  { %v2365_v57 = vpop.xlane.xlu1 %2364 }
0x1407   :  { %v2362_v39 = vpop.xlane.xlu0 %2361  ;;  %v2371_v18 = vpop.xlane.xlu1 %2370 }
0x1408   :  { %4944 = vrcp.f32 %v2362_v39 }
0x1409   :  { %4946 = vrcp.f32 %v2365_v57 }
0x140a   :  { %v4941_v56 = vpop.eup %4940 }
0x140b   :  { %v2368_v51 = vpop.xlane.xlu0 %2367  ;;  %v2386_v45 = vmul.f32 %v4941_v56, %v4927_v61  ;;  %v2377_v40 = vpop.xlane.xlu1 %2376 }
0x140c   :  { %4948 = vrcp.f32 %v2368_v51  ;;  %v4943_v60 = vpop.eup %4942 }
0x140d   :  { %4585 = vmatprep.mubr.msk.f32.mxu1 %vm280_vm3, %v2386_v45  ;;  %4950 = vrcp.f32 %v2371_v18  ;;  %v2387_v63 = vmul.f32 %v4943_v60, %v4925_v7 }
0x140f   :  { %v2374_v58 = vpop.xlane.xlu0 %2373 }
0x1410   :  { %4952 = vrcp.f32 %v2374_v58 }
0x1411   :  { %4954 = vrcp.f32 %v2377_v40  ;;  %v5052_v40 = vld [vmem:[%s6077_s1 + $0xb8] sm:$0xff] }
0x1412   :  { %v4945_v48 = vpop.eup %4944 }
0x1413   :  { %v4802_v19 = vpop.permute.xlu0 %4801  ;;  %v4947_v59 = vpop.eup %4946  ;;  %v2388_v4 = vmul.f32 %v4945_v48, %v4933_v44  ;;  %v5053_v48 = vld [vmem:[%s6077_s1 + $0xb0] sm:$0xff] }
0x1414   :  { %v4804_v14 = vunpack.i.h.bf16 %v4802_v19  ;;  %v4803_v17 = vunpack.i.l.bf16 %v4802_v19  ;;  %v2389_v61 = vmul.f32 %v4947_v59, %v4929_v43  ;;  %v2709_v43 = vld [vmem:[%s6077_s1 + $0x168] sm:$0xff]  ;;  %v2710_v59 = vld [vmem:[%s6077_s1 + $0x170] sm:$0xff] }
0x1416   :  { %v4742_v21 = vpack.c.bf16 %v4804_v14, %v4803_v17  ;;  %v4949_v62 = vpop.eup %4948 }
0x1417   :  { %v4951_v38 = vpop.eup %4950  ;;  %v2390_v6 = vmul.f32 %v4949_v62, %v4937_v30 }
0x1418   :  { %4743 = vmatprep.subr.bf16.mxu1 %v4742_v21  ;;  %v2391_v7 = vmul.f32 %v4951_v38, %v4931_v35 }
0x1419   :  { %4745 = vmatpush3.bf16.msra.mxu1 %v4742_v21 }
0x141a   :  { %4597 = vmatprep.subr.mxu1 %v5051_v1  ;;  %v4953_v8 = vpop.eup %4952 }
0x141b   :  { %v4955_v5 = vpop.eup %4954  ;;  %v2392_v15 = vmul.f32 %v4953_v8, %v4939_v52 }
0x141c   :  { %4586 = vmatmul.mubr.msk.f32.vlgmr.msra.gmra.mrb[32].mxu1 %vm280_vm3, %v2387_v63  ;;  %v2393_v28 = vmul.f32 %v4955_v5, %v4935_v26 }
0x141d   :  { %4588 = vmatprep.mubr.msk.f32.mxu1 %vm280_vm3, %v2388_v4  ;;  %4598 = vmatpush3.msra.mxu1 %v5051_v1  ;;  %v2711_v1 = vld [vmem:[%s6077_s1 + $0x178] sm:$0xff] }
0x141e   :  { %4607 = vmatprep.subr.mxu1 %v2709_v43 }
0x1420   :  { %4589 = vmatmul.mubr.msk.f32.gmra.mrb[34].mxu1 %vm280_vm3, %v2389_v61 }
0x1421   :  { %4591 = vmatprep.mubr.msk.f32.mxu1 %vm280_vm3, %v2390_v6 }
0x1424   :  { %4592 = vmatmul.mubr.msk.f32.gmra.mrb[36].mxu1 %vm280_vm3, %v2391_v7 }
0x1425   :  { %4594 = vmatprep.mubr.msk.f32.mxu1 %vm280_vm3, %v2392_v15 }
0x1428   :  { %4595 = vmatmul.mubr.msk.f32.gmra.mrb[38].mxu1 %vm280_vm3, %v2393_v28 }
0x14ef   :  { %v4587_v31 = vpop.f32.mrb[32].mxu1 }
0x14f0   :  { %v2490_v44 = vpop.f32.mrb[33].mxu1  ;;  %v2530_v47 = vmul.f32 %v5535_v24, %v4587_v31 }
0x14f1   :  { %v2529_v9 = vmul.f32 %v5547_v32, %v2490_v44 }
0x14f3   :  { %v4590_v46 = vpop.f32.mrb[34].mxu1 }
0x14f4   :  { %v2532_v35 = vmul.f32 %v5541_v27, %v4590_v46  ;;  %v2500_v30 = vpop.f32.mrb[35].mxu1 }
0x14f5   :  { %v2531_v49 = vmul.f32 %v5553_v36, %v2500_v30 }
0x14f6   :  { %v2538_v26 = vadd.f32 %v2532_v35, %v2530_v47 }
0x14f7   :  { %v2537_v52 = vadd.f32 %v2531_v49, %v2529_v9  ;;  %v4593_v37 = vpop.f32.mrb[36].mxu1 }
0x14f8   :  { %v2534_v53 = vmul.f32 %v5559_v16, %v4593_v37  ;;  %v2510_v55 = vpop.f32.mrb[37].mxu1 }
0x14f9   :  { %v2533_v39 = vmul.f32 %v5565_v42, %v2510_v55 }
0x14fa   :  { %v2540_v56 = vadd.f32 %v2538_v26, %v2534_v53 }
0x14fb   :  { %v2539_v57 = vadd.f32 %v2537_v52, %v2533_v39  ;;  %v4596_v51 = vpop.f32.mrb[38].mxu1 }
0x14fc   :  { %v2536_v45 = vmul.f32 %v5571_v33, %v4596_v51  ;;  %v2520_v58 = vpop.f32.mrb[39].mxu1 }
0x14fd   :  { %v2535_v18 = vmul.f32 %v5577_v50, %v2520_v58 }
0x14fe   :  { %v2542_v19 = vadd.f32 %v2540_v56, %v2536_v45 }
0x14ff   :  { %v2541_v14 = vadd.f32 %v2539_v57, %v2535_v18 }
0x1501   :  { %4599 = vmatprep.mubr.msk.f32.mxu1 %vm51_vm1, %v2541_v14 }
0x1502   :  { %4600 = vmatmul.mubr.msk.f32.vlgmr.msra.gmra.mrb[40].mxu1 %vm51_vm1, %v2542_v19 }
0x1503   :  { %4608 = vmatpush3.msra.mxu1 %v2709_v43  ;;  %4609 = vmatprep.mubr.msk.f32.mxu1 %vm51_vm1, %v5293_v20 }
0x1506   :  { %4610 = vmatmul.mubr.msk.f32.vlgmr.msra.gmra.mrb[42].mxu1 %vm51_vm1, %v5301_v22 }
0x15d5   :  { %v4601_v17 = vpop.f32.mrb[40].mxu1 }
0x15d6   :  { %v2621_v21 = vadd.f32 %v5052_v40, %v4601_v17  ;;  %v2615_v60 = vpop.f32.mrb[41].mxu1 }
0x15d7   :  { %v2616_v63 = vadd.f32 %v5053_v48, %v2615_v60 }
0x15d8   :  { %v5781_v61 = vadd.f32 %v2621_v21, %v5635_v34 }
0x15d9   :  { %v5778_v4 = vadd.f32 %v2616_v63, %v5627_v29  ;;  %v4611_v62 = vpop.f32.mrb[42].mxu1 }
0x15da   :  { %v2784_v38 = vadd.f32 %v4611_v62, %v2711_v1  ;;  %v2778_v6 = vpop.f32.mrb[43].mxu1 }
0x15db   :  { %v2779_v8 = vadd.f32 %v2778_v6, %v2710_v59  ;;  %4604 = vmatprep.mubr.msk.f32.mxu0 %vm51_vm1, %v5778_v4 }
0x15dc   :  { %4605 = vmatmul.mubr.msk.f32.vlgmr.msra.gmra.mrb[46].mxu0 %vm51_vm1, %v5781_v61  ;;  %v2788_v43 = vmul.f32 %v5535_v24, %v2784_v38  ;;  %v2790_v44 = vmul.f32 %v5541_v27, %v2784_v38  ;;  %v2792_v47 = vmul.f32 %v5559_v16, %v2784_v38  ;;  %v2794_v30 = vmul.f32 %v5571_v33, %v2784_v38 }
0x15dd   :  { %v5787_v7 = vpack.i.bf16 %v2784_v38, %v2779_v8  ;;  %v2787_v5 = vmul.f32 %v5547_v32, %v2779_v8  ;;  %v2789_v31 = vmul.f32 %v5553_v36, %v2779_v8  ;;  %v2791_v46 = vmul.f32 %v5565_v42, %v2779_v8 }
0x15de   :  { %v2793_v35 = vmul.f32 %v5577_v50, %v2779_v8 }
0x15df   :  { %4806 = vrot.lane.b32.xlu1 %v5787_v7, %s5067_s25  ;;  %4616 = vmatprep.mubr.msk.f32.mxu0 %vm51_vm1, %v2787_v5 }
0x1651   :  { %v4807_v29 = vpop.permute.xlu1 %4806 }
0x1652   :  { %v4809_v34 = vunpack.i.h.bf16 %v4807_v29  ;;  %v4808_v15 = vunpack.i.l.bf16 %v4807_v29 }
0x1654   :  { %v4746_v28 = vpack.c.bf16 %v4809_v34, %v4808_v15 }
0x1656   :  { %4748 = vmatprep.subr.msk.bf16.mxu0 %vm5136_vm2, %v4746_v28 }
0x1657   :  { %4751 = vmatpush3.bf16.xpose.msk.msra.mxu0 %vm5136_vm2, %v4746_v28 }
0x165e   :  { %4617 = vmatmul.mubr.msk.f32.vlgmr.msra.gmra.mrb[48].mxu0 %vm51_vm1, %v2788_v43 }
0x165f   :  { %4619 = vmatprep.mubr.msk.f32.mxu0 %vm51_vm1, %v2789_v31 }
0x1662   :  { %4620 = vmatmul.mubr.msk.f32.gmra.mrb[50].mxu0 %vm51_vm1, %v2790_v44 }
0x1663   :  { %4622 = vmatprep.mubr.msk.f32.mxu0 %vm51_vm1, %v2791_v46 }
0x1666   :  { %4623 = vmatmul.mubr.msk.f32.gmra.mrb[52].mxu0 %vm51_vm1, %v2792_v47 }
0x1667   :  { %4625 = vmatprep.mubr.msk.f32.mxu0 %vm51_vm1, %v2793_v35 }
0x166a   :  { %4626 = vmatmul.mubr.msk.f32.gmra.mrb[54].mxu0 %vm51_vm1, %v2794_v30 }
0x16af   :  { %v5811_v9 = vpop.f32.mrb[46].mxu0 }
0x16b0   :  { %v5813_v49 = vpop.f32.mrb[47].mxu0 }
0x1731   :  { %v4618_v26 = vpop.f32.mrb[48].mxu0 }
0x1732   :  { %v2901_v52 = vadd.f32 %v5674_v0, %v4618_v26  ;;  %v2895_v37 = vpop.f32.mrb[49].mxu0 }
0x1733   :  { %v2896_v53 = vadd.f32 %v5680_v2, %v2895_v37 }
0x1734   :  { %v2937_v55 = vsel %vm280_vm3, %v2901_v52, -inf }
0x1735   :  { %2938 = vmax.xlane.f32.xlu0 %v2937_v55  ;;  %v4621_v39 = vpop.f32.mrb[50].mxu0  ;;  %v2934_v56 = vsel %vm280_vm3, %v2896_v53, -inf }
0x1736   :  { %v2911_v57 = vadd.f32 %v5688_v54, %v4621_v39  ;;  %v2905_v51 = vpop.f32.mrb[51].mxu0  ;;  %2935 = vmax.xlane.f32.xlu1 %v2934_v56 }
0x1737   :  { %v2906_v45 = vadd.f32 %v5695_v11, %v2905_v51 }
0x1738   :  { %v2943_v58 = vsel %vm280_vm3, %v2911_v57, -inf }
0x1739   :  { %v4624_v18 = vpop.f32.mrb[52].mxu0  ;;  %v2940_v19 = vsel %vm280_vm3, %v2906_v45, -inf }
0x173a   :  { %v2921_v14 = vadd.f32 %v5701_v3, %v4624_v18  ;;  %v2915_v17 = vpop.f32.mrb[53].mxu0  ;;  %2941 = vmax.xlane.f32.xlu0 %v2940_v19  ;;  %2944 = vmax.xlane.f32.xlu1 %v2943_v58 }
0x173b   :  { %v2916_v40 = vadd.f32 %v5708_v41, %v2915_v17 }
0x173c   :  { %v2949_v21 = vsel %vm280_vm3, %v2921_v14, -inf }
0x173d   :  { %v4627_v60 = vpop.f32.mrb[54].mxu0  ;;  %v2946_v48 = vsel %vm280_vm3, %v2916_v40, -inf }
0x173e   :  { %v2931_v63 = vadd.f32 %v5715_v25, %v4627_v60  ;;  %v2925_v1 = vpop.f32.mrb[55].mxu0  ;;  %2947 = vmax.xlane.f32.xlu0 %v2946_v48  ;;  %2950 = vmax.xlane.f32.xlu1 %v2949_v21 }
0x173f   :  { %v2926_v59 = vadd.f32 %v5722_v10, %v2925_v1 }
0x1740   :  { %v2955_v62 = vsel %vm280_vm3, %v2931_v63, -inf }
0x1741   :  { %v2952_v38 = vsel %vm280_vm3, %v2926_v59, -inf }
0x1742   :  { %2953 = vmax.xlane.f32.xlu0 %v2952_v38  ;;  %2956 = vmax.xlane.f32.xlu1 %v2955_v62 }
0x17c2   :  { %v2939_v6 = vpop.xlane.xlu0 %2938 }
0x17c3   :  { %v2959_v8 = vsub.f32 %v2901_v52, %v2939_v6  ;;  %v2936_v5 = vpop.xlane.xlu1 %2935 }
0x17c4   :  { %v2958_v29 = vsub.f32 %v2896_v53, %v2936_v5 }
0x17c5   :  { %v2968_v34 = vmul.f32 1.442695, %v2959_v8 }
0x17c6   :  { %v2966_v15 = vmul.f32 1.442695, %v2958_v29 }
0x17c7   :  { %4956 = vpow2.f32 %v2968_v34  ;;  %v2942_v28 = vpop.xlane.xlu0 %2941  ;;  %v2945_v43 = vpop.xlane.xlu1 %2944 }
0x17c8   :  { %4958 = vpow2.f32 %v2966_v15  ;;  %v2960_v31 = vsub.f32 %v2906_v45, %v2942_v28  ;;  %v2961_v44 = vsub.f32 %v2911_v57, %v2945_v43 }
0x17ca   :  { %v2970_v46 = vmul.f32 1.442695, %v2960_v31  ;;  %v2972_v47 = vmul.f32 1.442695, %v2961_v44 }
0x17cb   :  { %v2948_v35 = vpop.xlane.xlu0 %2947  ;;  %v2951_v30 = vpop.xlane.xlu1 %2950 }
0x17cc   :  { %4960 = vpow2.f32 %v2970_v46  ;;  %v2962_v26 = vsub.f32 %v2916_v40, %v2948_v35  ;;  %v2963_v37 = vsub.f32 %v2921_v14, %v2951_v30 }
0x17cd   :  { %4962 = vpow2.f32 %v2972_v47 }
0x17ce   :  { %v2974_v55 = vmul.f32 1.442695, %v2962_v26  ;;  %v2976_v52 = vmul.f32 1.442695, %v2963_v37 }
0x17cf   :  { %v2954_v39 = vpop.xlane.xlu0 %2953  ;;  %v2957_v53 = vpop.xlane.xlu1 %2956 }
0x17d0   :  { %4964 = vpow2.f32 %v2974_v55  ;;  %v2964_v56 = vsub.f32 %v2926_v59, %v2954_v39  ;;  %v2965_v51 = vsub.f32 %v2931_v63, %v2957_v53 }
0x17d1   :  { %v4957_v58 = vpop.eup %4956  ;;  %4966 = vpow2.f32 %v2976_v52 }
0x17d2   :  { %v4959_v18 = vpop.eup %4958  ;;  %v2978_v45 = vmul.f32 1.442695, %v2964_v56  ;;  %v2980_v57 = vmul.f32 1.442695, %v2965_v51  ;;  %v2985_v19 = vsel %vm280_vm3, %v4957_v58, 0.0 }
0x17d3   :  { %2986 = vadd.xlane.f32.xlu1 %v2985_v19  ;;  %v2982_v17 = vsel %vm280_vm3, %v4959_v18, 0.0 }
0x17d4   :  { %4968 = vpow2.f32 %v2978_v45  ;;  %2983 = vadd.xlane.f32.xlu0 %v2982_v17 }
0x17d5   :  { %4970 = vpow2.f32 %v2980_v57 }
0x17d6   :  { %v4961_v14 = vpop.eup %4960 }
0x17d7   :  { %v4963_v40 = vpop.eup %4962  ;;  %v2988_v21 = vsel %vm280_vm3, %v4961_v14, 0.0 }
0x17d8   :  { %2989 = vadd.xlane.f32.xlu0 %v2988_v21  ;;  %v2991_v60 = vsel %vm280_vm3, %v4963_v40, 0.0 }
0x17d9   :  { %2992 = vadd.xlane.f32.xlu1 %v2991_v60  ;;  %v3257_v60 = vld [vmem:[%s6077_s1 + $0x198] sm:$0xff] }
0x17da   :  { %v4965_v48 = vpop.eup %4964  ;;  %4649 = vmatprep.subr.mxu0 %v3257_v60 }
0x17db   :  { %v4967_v63 = vpop.eup %4966  ;;  %v2994_v1 = vsel %vm280_vm3, %v4965_v48, 0.0  ;;  %4650 = vmatpush3.msra.mxu0 %v3257_v60 }
0x17dc   :  { %2995 = vadd.xlane.f32.xlu0 %v2994_v1  ;;  %v2997_v59 = vsel %vm280_vm3, %v4967_v63, 0.0 }
0x17dd   :  { %2998 = vadd.xlane.f32.xlu1 %v2997_v59 }
0x17de   :  { %v4969_v62 = vpop.eup %4968 }
0x17df   :  { %v4971_v38 = vpop.eup %4970  ;;  %v3000_v6 = vsel %vm280_vm3, %v4969_v62, 0.0 }
0x17e0   :  { %3001 = vadd.xlane.f32.xlu0 %v3000_v6  ;;  %v3003_v8 = vsel %vm280_vm3, %v4971_v38, 0.0 }
0x17e1   :  { %3004 = vadd.xlane.f32.xlu1 %v3003_v8 }
0x17f6   :  { %4811 = vrot.lane.b32.xlu0 %v5787_v7, %s5068_s29 }
0x1860   :  { %v2987_v29 = vpop.xlane.xlu1 %2986 }
0x1861   :  { %v2984_v5 = vpop.xlane.xlu0 %2983 }
0x1862   :  { %4972 = vrcp.f32 %v2984_v5 }
0x1863   :  { %4974 = vrcp.f32 %v2987_v29 }
0x1865   :  { %v2990_v34 = vpop.xlane.xlu0 %2989 }
0x1866   :  { %v2993_v15 = vpop.xlane.xlu1 %2992  ;;  %4976 = vrcp.f32 %v2990_v34 }
0x1867   :  { %4978 = vrcp.f32 %v2993_v15 }
0x1869   :  { %v2996_v28 = vpop.xlane.xlu0 %2995 }
0x186a   :  { %v2999_v46 = vpop.xlane.xlu1 %2998  ;;  %4980 = vrcp.f32 %v2996_v28 }
0x186b   :  { %4982 = vrcp.f32 %v2999_v46 }
0x186c   :  { %v4973_v43 = vpop.eup %4972 }
0x186d   :  { %v3002_v31 = vpop.xlane.xlu0 %3001  ;;  %v3014_v44 = vmul.f32 %v4973_v43, %v4959_v18  ;;  %v4975_v37 = vpop.eup %4974 }
0x186e   :  { %4984 = vrcp.f32 %v3002_v31  ;;  %v3005_v7 = vpop.xlane.xlu1 %3004  ;;  %v3015_v52 = vmul.f32 %v4975_v37, %v4957_v58 }
0x186f   :  { %4632 = vmatprep.mubr.msk.f32.mxu1 %vm280_vm3, %v3014_v44  ;;  %4986 = vrcp.f32 %v3005_v7 }
0x1870   :  { %v4977_v55 = vpop.eup %4976 }
0x1871   :  { %v4812_v47 = vpop.permute.xlu0 %4811  ;;  %v4979_v39 = vpop.eup %4978  ;;  %v3016_v53 = vmul.f32 %v4977_v55, %v4961_v14  ;;  %v3171_v14 = vld [vmem:[%s6077_s1 + $0x180] sm:$0xff] }
0x1872   :  { %v4814_v35 = vunpack.i.h.bf16 %v4812_v47  ;;  %v4813_v30 = vunpack.i.l.bf16 %v4812_v47  ;;  %v3017_v51 = vmul.f32 %v4979_v39, %v4963_v40  ;;  %v3341_v40 = vld [vmem:[%s6077_s1 + $0x1b0] sm:$0xff]  ;;  %v3343_v55 = vld [vmem:[%s6077_s1 + $0x1c0] sm:$0xff] }
0x1874   :  { %v4752_v26 = vpack.c.bf16 %v4814_v35, %v4813_v30  ;;  %v4981_v56 = vpop.eup %4980 }
0x1875   :  { %v4983_v18 = vpop.eup %4982  ;;  %v3018_v45 = vmul.f32 %v4981_v56, %v4965_v48 }
0x1876   :  { %4753 = vmatprep.subr.bf16.mxu1 %v4752_v26  ;;  %v3019_v19 = vmul.f32 %v4983_v18, %v4967_v63 }
0x1877   :  { %4755 = vmatpush3.bf16.msra.mxu1 %v4752_v26 }
0x1878   :  { %v4985_v57 = vpop.eup %4984  ;;  %4644 = vmatprep.subr.mxu1 %v3171_v14 }
0x1879   :  { %v4987_v17 = vpop.eup %4986  ;;  %v3020_v21 = vmul.f32 %v4985_v57, %v4969_v62  ;;  %v3258_v57 = vld [vmem:[%s6077_s1 + $0x1a0] sm:$0xff] }
0x187a   :  { %4633 = vmatmul.mubr.msk.f32.vlgmr.msra.gmra.mrb[44].mxu1 %vm280_vm3, %v3015_v52  ;;  %v3021_v58 = vmul.f32 %v4987_v17, %v4971_v38 }
0x187b   :  { %4635 = vmatprep.mubr.msk.f32.mxu1 %vm280_vm3, %v3016_v53  ;;  %4645 = vmatpush3.msra.mxu1 %v3171_v14  ;;  %v5923_v14 = vld [vmem:[%s6077_s1 + $0x10] sm:$0xff] }
0x187c   :  { %4654 = vmatprep.subr.mxu1 %v3341_v40 }
0x187e   :  { %4636 = vmatmul.mubr.msk.f32.gmra.mrb[46].mxu1 %vm280_vm3, %v3017_v51 }
0x187f   :  { %4638 = vmatprep.mubr.msk.f32.mxu1 %vm280_vm3, %v3018_v45 }
0x1882   :  { %4639 = vmatmul.mubr.msk.f32.gmra.mrb[48].mxu1 %vm280_vm3, %v3019_v19 }
0x1883   :  { %4641 = vmatprep.mubr.msk.f32.mxu1 %vm280_vm3, %v3020_v21 }
0x1886   :  { %4642 = vmatmul.mubr.msk.f32.gmra.mrb[50].mxu1 %vm280_vm3, %v3021_v58 }
0x194d   :  { %v4634_v48 = vpop.f32.mrb[44].mxu1 }
0x194e   :  { %v3118_v63 = vpop.f32.mrb[45].mxu1  ;;  %v3158_v59 = vmul.f32 %v5535_v24, %v4634_v48  ;;  %v5936_v48 = vld [vmem:[%s6077_s1 + $0x20] sm:$0xff] }
0x194f   :  { %v3157_v6 = vmul.f32 %v5547_v32, %v3118_v63 }
0x1951   :  { %v4637_v1 = vpop.f32.mrb[46].mxu1 }
0x1952   :  { %v3160_v62 = vmul.f32 %v5541_v27, %v4637_v1  ;;  %v3128_v38 = vpop.f32.mrb[47].mxu1  ;;  %v5054_v27 = vld [vmem:[%s6077_s1 + $0xc8] sm:$0xff] }
0x1953   :  { %v3159_v8 = vmul.f32 %v5553_v36, %v3128_v38  ;;  %v2699_v32 = vadd.f32 %v5054_v27, %v5813_v49  ;;  %v5944_v1 = vld [vmem:[%s6077_s1 + $0x28] sm:$0xff] }
0x1954   :  { %v3166_v5 = vadd.f32 %v3160_v62, %v3158_v59  ;;  %v5950_v62 = vld [vmem:[%s6077_s1 + $0x30] sm:$0xff] }
0x1955   :  { %v3165_v29 = vadd.f32 %v3159_v8, %v3157_v6  ;;  %v4640_v34 = vpop.f32.mrb[48].mxu1  ;;  %v2707_v7 = vadd.f32 %v2699_v32, %v5778_v4  ;;  %v5958_v6 = vld [vmem:[%s6077_s1 + $0x38] sm:$0xff] }
0x1956   :  { %v3162_v15 = vmul.f32 %v5559_v16, %v4640_v34  ;;  %v3138_v28 = vpop.f32.mrb[49].mxu1  ;;  %v5055_v16 = vld [vmem:[%s6077_s1 + $0xd0] sm:$0xff]  ;;  %v5972_v34 = vld [vmem:[%s6077_s1 + $0x48] sm:$0xff] }
0x1957   :  { %v3161_v43 = vmul.f32 %v5565_v42, %v3138_v28  ;;  %v2704_v42 = vadd.f32 %v5055_v16, %v5811_v9  ;;  %v3172_v9 = vld [vmem:[%s6077_s1 + $0x188] sm:$0xff] }
0x1958   :  { %v3168_v31 = vadd.f32 %v3166_v5, %v3162_v15  ;;  %v5964_v5 = vld [vmem:[%s6077_s1 + $0x40] sm:$0xff] }
0x1959   :  { %v3167_v44 = vadd.f32 %v3165_v29, %v3161_v43  ;;  %v4643_v46 = vpop.f32.mrb[50].mxu1 }
0x195a   :  { %v3164_v24 = vmul.f32 %v5571_v33, %v4643_v46  ;;  %v3148_v47 = vpop.f32.mrb[51].mxu1  ;;  %v2708_v33 = vadd.f32 %v2704_v42, %v5781_v61  ;;  %v3342_v61 = vld [vmem:[%s6077_s1 + $0x1b8] sm:$0xff] }
0x195b   :  { %v3163_v36 = vmul.f32 %v5577_v50, %v3148_v47  ;;  %v3173_v50 = vld [vmem:[%s6077_s1 + $0x190] sm:$0xff] }
0x195c   :  { %v3170_v35 = vadd.f32 %v3168_v31, %v3164_v24 }
0x195d   :  { %v3169_v30 = vadd.f32 %v3167_v44, %v3163_v36 }
0x195f   :  { %4646 = vmatprep.mubr.msk.f32.mxu1 %vm51_vm1, %v3169_v30 }
0x1960   :  { %4647 = vmatmul.mubr.msk.f32.vlgmr.msra.gmra.mrb[52].mxu1 %vm51_vm1, %v3170_v35 }
0x1961   :  { %4656 = vmatprep.mubr.msk.f32.mxu1 %vm51_vm1, %v2707_v7  ;;  %4655 = vmatpush3.msra.mxu1 %v3341_v40  ;;  %v5929_v40 = vld [vmem:[%s6077_s1 + $0x18] sm:$0xff] }
0x1964   :  { %4657 = vmatmul.mubr.msk.f32.vlgmr.msra.gmra.mrb[54].mxu1 %vm51_vm1, %v2708_v33 }
0x1a33   :  { %v4648_v4 = vpop.f32.mrb[52].mxu1 }
0x1a34   :  { %v3252_v49 = vadd.f32 %v4648_v4, %v3173_v50  ;;  %v3246_v26 = vpop.f32.mrb[53].mxu1 }
0x1a35   :  { %v3247_v37 = vadd.f32 %v3246_v26, %v3172_v9 }
0x1a36   :  { %v5896_v53 = vadd.f32 %v3252_v49, %v5301_v22  ;;  %v3259_v22 = vld [vmem:[%s6077_s1 + $0x1a8] sm:$0xff] }
0x1a37   :  { %v5893_v52 = vadd.f32 %v3247_v37, %v5293_v20  ;;  %v4658_v39 = vpop.f32.mrb[54].mxu1 }
0x1a38   :  { %v5898_v56 = vadd.f32 %v4658_v39, %v3343_v55  ;;  %v3416_v51 = vpop.f32.mrb[55].mxu1 }
0x1a39   :  { %v5900_v18 = vadd.f32 %v3416_v51, %v3342_v61  ;;  %4651 = vmatprep.mubr.msk.f32.mxu0 %vm51_vm1, %v5893_v52 }
0x1a3a   :  { %4652 = vmatmul.mubr.msk.f32.vlgmr.msra.gmra.mrb[56].mxu0 %vm51_vm1, %v5896_v53 }
0x1a3b   :  { %v4815_v45 = vpack.i.bf16 %v5898_v56, %v5900_v18  ;;  %v4756_v20 = vpack.c.bf16 %v5898_v56, %v5900_v18 }
0x1a3d   :  { %4758 = vmatprep.subr.msk.bf16.mxu0 %vm5136_vm2, %v4756_v20 }
0x1a3e   :  { %4761 = vmatpush3.bf16.xpose.msk.msra.mxu0 %vm5136_vm2, %v4756_v20 }
0x1b0d   :  { %v4653_v19 = vpop.f32.mrb[56].mxu0 }
0x1b0e   :  { %v3338_v17 = vadd.f32 %v4653_v19, %v3259_v22  ;;  %v3332_v21 = vpop.f32.mrb[57].mxu0 }
0x1b0f   :  { %v3333_v58 = vadd.f32 %v3332_v21, %v3258_v57 }
0x1b10   :  { %v3426_v60 = vmul.f32 %v5929_v40, %v3338_v17  ;;  %v3428_v59 = vmul.f32 %v5944_v1, %v3338_v17  ;;  %v3430_v8 = vmul.f32 %v5958_v6, %v3338_v17  ;;  %v3432_v15 = vmul.f32 %v5972_v34, %v3338_v17 }
0x1b11   :  { %v3425_v23 = vmul.f32 %v5923_v14, %v3333_v58  ;;  %v3427_v63 = vmul.f32 %v5936_v48, %v3333_v58  ;;  %v3429_v38 = vmul.f32 %v5950_v62, %v3333_v58  ;;  %v3431_v29 = vmul.f32 %v5964_v5, %v3333_v58 }
0x1b13   :  { %4663 = vmatprep.mubr.msk.f32.mxu0 %vm51_vm1, %v3425_v23 }
0x1b14   :  { %4664 = vmatmul.mubr.msk.f32.vlgmr.msra.gmra.mrb[58].mxu0 %vm51_vm1, %v3426_v60 }
0x1b15   :  { %4666 = vmatprep.mubr.msk.f32.mxu0 %vm51_vm1, %v3427_v63 }
0x1b18   :  { %4667 = vmatmul.mubr.msk.f32.gmra.mrb[60].mxu0 %vm51_vm1, %v3428_v59 }
0x1b19   :  { %4669 = vmatprep.mubr.msk.f32.mxu0 %vm51_vm1, %v3429_v38 }
0x1b1c   :  { %4670 = vmatmul.mubr.msk.f32.gmra.mrb[62].mxu0 %vm51_vm1, %v3430_v8 }
0x1b1d   :  { %4672 = vmatprep.mubr.msk.f32.mxu0 %vm51_vm1, %v3431_v29 }
0x1b20   :  { %4673 = vmatmul.mubr.msk.f32.gmra.mrb[64].mxu0 %vm51_vm1, %v3432_v15 }
0x1be7   :  { %v4665_v28 = vpop.f32.mrb[58].mxu0 }
0x1be8   :  { %v3535_v43 = vadd.f32 %v5674_v0, %v4665_v28  ;;  %v3529_v31 = vpop.f32.mrb[59].mxu0 }
0x1be9   :  { %v3530_v44 = vadd.f32 %v5680_v2, %v3529_v31 }
0x1bea   :  { %v3571_v46 = vsel %vm280_vm3, %v3535_v43, -inf }
0x1beb   :  { %3572 = vmax.xlane.f32.xlu1 %v3571_v46  ;;  %v4668_v24 = vpop.f32.mrb[60].mxu0  ;;  %v3568_v32 = vsel %vm280_vm3, %v3530_v44, -inf }
0x1bec   :  { %v3539_v47 = vpop.f32.mrb[61].mxu0  ;;  %v3545_v27 = vadd.f32 %v5688_v54, %v4668_v24 }
0x1bed   :  { %v3540_v30 = vadd.f32 %v5695_v11, %v3539_v47 }
0x1bee   :  { %v3577_v16 = vsel %vm280_vm3, %v3545_v27, -inf }
0x1bef   :  { %v4671_v36 = vpop.f32.mrb[62].mxu0  ;;  %3569 = vmax.xlane.f32.xlu1 %v3568_v32  ;;  %v3574_v33 = vsel %vm280_vm3, %v3540_v30, -inf }
0x1bf0   :  { %v3549_v35 = vpop.f32.mrb[63].mxu0  ;;  %v3555_v50 = vadd.f32 %v5701_v3, %v4671_v36 }
0x1bf1   :  { %v3550_v7 = vadd.f32 %v5708_v41, %v3549_v35 }
0x1bf2   :  { %v3583_v4 = vsel %vm280_vm3, %v3555_v50, -inf }
0x1bf3   :  { %v4674_v0 = vpop.f32.mrb[64].mxu0  ;;  %3578 = vmax.xlane.f32.xlu1 %v3577_v16  ;;  %v3580_v9 = vsel %vm280_vm3, %v3550_v7, -inf }
0x1bf4   :  { %v3559_v42 = vpop.f32.mrb[65].mxu0  ;;  %v3565_v11 = vadd.f32 %v5715_v25, %v4674_v0 }
0x1bf5   :  { %v3560_v2 = vadd.f32 %v5722_v10, %v3559_v42 }
0x1bf6   :  { %v3589_v10 = vsel %vm280_vm3, %v3565_v11, -inf }
0x1bf7   :  { %3575 = vmax.xlane.f32.xlu1 %v3574_v33  ;;  %v3586_v54 = vsel %vm280_vm3, %v3560_v2, -inf }
0x1bf8   :  { %3587 = vmax.xlane.f32.xlu0 %v3586_v54 }
0x1bfb   :  { %3581 = vmax.xlane.f32.xlu1 %v3580_v9 }
0x1bff   :  { %3584 = vmax.xlane.f32.xlu1 %v3583_v4 }
0x1c03   :  { %3590 = vmax.xlane.f32.xlu1 %v3589_v10 }
0x1c78   :  { %v3573_v41 = vpop.xlane.xlu1 %3572 }
0x1c79   :  { %v3593_v49 = vsub.f32 %v3535_v43, %v3573_v41 }
0x1c7b   :  { %v3602_v26 = vmul.f32 1.442695, %v3593_v49 }
0x1c7c   :  { %v3570_v37 = vpop.xlane.xlu1 %3569 }
0x1c7d   :  { %4988 = vpow2.f32 %v3602_v26  ;;  %v3592_v55 = vsub.f32 %v3530_v44, %v3570_v37 }
0x1c7f   :  { %v3600_v61 = vmul.f32 1.442695, %v3592_v55 }
0x1c80   :  { %v3579_v39 = vpop.xlane.xlu1 %3578 }
0x1c81   :  { %4990 = vpow2.f32 %v3600_v61  ;;  %v3595_v3 = vsub.f32 %v3545_v27, %v3579_v39 }
0x1c83   :  { %v3606_v51 = vmul.f32 1.442695, %v3595_v3 }
0x1c84   :  { %v3576_v20 = vpop.xlane.xlu1 %3575 }
0x1c85   :  { %4992 = vpow2.f32 %v3606_v51  ;;  %v3594_v25 = vsub.f32 %v3540_v30, %v3576_v20  ;;  %v3588_v23 = vpop.xlane.xlu0 %3587 }
0x1c86   :  { %v3598_v8 = vsub.f32 %v3560_v2, %v3588_v23  ;;  %v5064_v23 = vld [vmem:[%s6077_s1 + $0x1f8] sm:$0xff] }
0x1c87   :  { %v5992_v22 = vpop.eup %4988  ;;  %v3604_v57 = vmul.f32 1.442695, %v3594_v25 }
0x1c88   :  { %v3582_v19 = vpop.xlane.xlu1 %3581  ;;  %v3619_v17 = vsel %vm280_vm3, %v5992_v22, 0.0  ;;  %v3612_v46 = vmul.f32 1.442695, %v3598_v8 }
0x1c89   :  { %4994 = vpow2.f32 %v3604_v57  ;;  %3620 = vadd.xlane.f32.xlu1 %v3619_v17  ;;  %v3596_v58 = vsub.f32 %v3550_v7, %v3582_v19 }
0x1c8b   :  { %v4991_v21 = vpop.eup %4990  ;;  %v3608_v29 = vmul.f32 1.442695, %v3596_v58  ;;  %v3805_v58 = vld [vmem:[%s6077_s1 + $0x1c8] sm:$0xff] }
0x1c8c   :  { %v3585_v60 = vpop.xlane.xlu1 %3584  ;;  %v3616_v63 = vsel %vm280_vm3, %v4991_v21, 0.0 }
0x1c8d   :  { %v3597_v59 = vsub.f32 %v3555_v50, %v3585_v60  ;;  %3617 = vadd.xlane.f32.xlu1 %v3616_v63  ;;  %v3891_v60 = vld [vmem:[%s6077_s1 + $0x1e0] sm:$0xff] }
0x1c8e   :  { %4696 = vmatprep.subr.mxu0 %v3891_v60 }
0x1c8f   :  { %v5997_v38 = vpop.eup %4992  ;;  %v3610_v15 = vmul.f32 1.442695, %v3597_v59  ;;  %4697 = vmatpush3.msra.mxu0 %v3891_v60 }
0x1c90   :  { %v3591_v28 = vpop.xlane.xlu1 %3590  ;;  %v3625_v43 = vsel %vm280_vm3, %v5997_v38, 0.0 }
0x1c91   :  { %4996 = vpow2.f32 %v3610_v15  ;;  %v3599_v31 = vsub.f32 %v3565_v11, %v3591_v28  ;;  %3626 = vadd.xlane.f32.xlu1 %v3625_v43 }
0x1c92   :  { %4998 = vpow2.f32 %v3608_v29 }
0x1c93   :  { %v4995_v44 = vpop.eup %4994  ;;  %v3614_v24 = vmul.f32 1.442695, %v3599_v31 }
0x1c94   :  { %v3622_v47 = vsel %vm280_vm3, %v4995_v44, 0.0 }
0x1c95   :  { %5000 = vpow2.f32 %v3614_v24  ;;  %3623 = vadd.xlane.f32.xlu1 %v3622_v47 }
0x1c96   :  { %5002 = vpow2.f32 %v3612_v46 }
0x1c9b   :  { %v4997_v27 = vpop.eup %4996 }
0x1c9c   :  { %v3631_v32 = vsel %vm280_vm3, %v4997_v27, 0.0  ;;  %v4999_v36 = vpop.eup %4998 }
0x1c9d   :  { %3632 = vadd.xlane.f32.xlu1 %v3631_v32  ;;  %v3628_v30 = vsel %vm280_vm3, %v4999_v36, 0.0 }
0x1c9f   :  { %v5001_v35 = vpop.eup %5000 }
0x1ca0   :  { %v3637_v16 = vsel %vm280_vm3, %v5001_v35, 0.0  ;;  %v5003_v0 = vpop.eup %5002 }
0x1ca1   :  { %3629 = vadd.xlane.f32.xlu1 %v3628_v30  ;;  %3638 = vadd.xlane.f32.xlu0 %v3637_v16  ;;  %v3634_v42 = vsel %vm280_vm3, %v5003_v0, 0.0 }
0x1ca5   :  { %3635 = vadd.xlane.f32.xlu1 %v3634_v42 }
0x1cb6   :  { %4816 = vrot.lane.b32.xlu1 %v4815_v45, %s5067_s25 }
0x1d16   :  { %v3621_v2 = vpop.xlane.xlu1 %3620 }
0x1d1a   :  { %v3618_v7 = vpop.xlane.xlu1 %3617 }
0x1d1b   :  { %5004 = vrcp.f32 %v3618_v7  ;;  %v3893_v7 = vld [vmem:[%s6077_s1 + $0x1f0] sm:$0xff] }
0x1d1c   :  { %5006 = vrcp.f32 %v3621_v2 }
0x1d1e   :  { %v3627_v33 = vpop.xlane.xlu1 %3626 }
0x1d22   :  { %v3624_v50 = vpop.xlane.xlu1 %3623 }
0x1d23   :  { %5008 = vrcp.f32 %v3624_v50 }
0x1d24   :  { %5010 = vrcp.f32 %v3627_v33  ;;  %v3892_v33 = vld [vmem:[%s6077_s1 + $0x1e8] sm:$0xff] }
0x1d25   :  { %v5005_v54 = vpop.eup %5004 }
0x1d26   :  { %v3648_v9 = vmul.f32 %v5005_v54, %v4991_v21  ;;  %v5007_v26 = vpop.eup %5006 }
0x1d27   :  { %v3649_v55 = vmul.f32 %v5007_v26, %v5992_v22 }
0x1d28   :  { %4679 = vmatprep.mubr.msk.f32.mxu1 %vm280_vm3, %v3648_v9 }
0x1d2a   :  { %v3633_v11 = vpop.xlane.xlu1 %3632 }
0x1d2d   :  { %v5009_v37 = vpop.eup %5008 }
0x1d2e   :  { %v3630_v4 = vpop.xlane.xlu1 %3629  ;;  %v3639_v18 = vpop.xlane.xlu0 %3638  ;;  %v3650_v39 = vmul.f32 %v5009_v37, %v4995_v44 }
0x1d2f   :  { %5012 = vrcp.f32 %v3630_v4  ;;  %v5011_v61 = vpop.eup %5010 }
0x1d30   :  { %5014 = vrcp.f32 %v3633_v11  ;;  %v3651_v51 = vmul.f32 %v5011_v61, %v5997_v38 }
0x1d32   :  { %v3636_v10 = vpop.xlane.xlu1 %3635 }
0x1d33   :  { %5016 = vrcp.f32 %v3636_v10  ;;  %v5065_v10 = vld [vmem:[%s6077_s1 + $0x208] sm:$0xff] }
0x1d34   :  { %5018 = vrcp.f32 %v3639_v18 }
0x1d36   :  { %v4817_v41 = vpop.permute.xlu1 %4816 }
0x1d37   :  { %v4819_v49 = vunpack.i.h.bf16 %v4817_v41  ;;  %v4818_v56 = vunpack.i.l.bf16 %v4817_v41 }
0x1d39   :  { %v4762_v45 = vpack.c.bf16 %v4819_v49, %v4818_v56  ;;  %v5013_v3 = vpop.eup %5012  ;;  %v5066_v56 = vld [vmem:[%s6077_s1 + $0x200] sm:$0xff] }
0x1d3a   :  { %v5015_v20 = vpop.eup %5014  ;;  %v3652_v25 = vmul.f32 %v5013_v3, %v4999_v36 }
0x1d3b   :  { %4763 = vmatprep.subr.bf16.mxu1 %v4762_v45  ;;  %v3653_v19 = vmul.f32 %v5015_v20, %v4997_v27 }
0x1d3c   :  { %4765 = vmatpush3.bf16.msra.mxu1 %v4762_v45 }
0x1d3d   :  { %v5017_v57 = vpop.eup %5016  ;;  %4691 = vmatprep.subr.mxu1 %v3805_v58 }
0x1d3e   :  { %v5019_v17 = vpop.eup %5018  ;;  %v3654_v21 = vmul.f32 %v5017_v57, %v5003_v0 }
0x1d3f   :  { %4680 = vmatmul.mubr.msk.f32.vlgmr.msra.gmra.mrb[56].mxu1 %vm280_vm3, %v3649_v55  ;;  %v3655_v22 = vmul.f32 %v5019_v17, %v5001_v35 }
0x1d40   :  { %4682 = vmatprep.mubr.msk.f32.mxu1 %vm280_vm3, %v3650_v39  ;;  %4692 = vmatpush3.msra.mxu1 %v3805_v58 }
0x1d41   :  { %4701 = vmatprep.subr.mxu1 %v5064_v23 }
0x1d43   :  { %4683 = vmatmul.mubr.msk.f32.gmra.mrb[58].mxu1 %vm280_vm3, %v3651_v51 }
0x1d44   :  { %4685 = vmatprep.mubr.msk.f32.mxu1 %vm280_vm3, %v3652_v25 }
0x1d47   :  { %4686 = vmatmul.mubr.msk.f32.gmra.mrb[60].mxu1 %vm280_vm3, %v3653_v19 }
0x1d48   :  { %4688 = vmatprep.mubr.msk.f32.mxu1 %vm280_vm3, %v3654_v21 }
0x1d4b   :  { %4689 = vmatmul.mubr.msk.f32.gmra.mrb[62].mxu1 %vm280_vm3, %v3655_v22 }
0x1e12   :  { %v4681_v63 = vpop.f32.mrb[56].mxu1 }
0x1e13   :  { %v3752_v59 = vpop.f32.mrb[57].mxu1  ;;  %v3792_v8 = vmul.f32 %v5929_v40, %v4681_v63 }
0x1e14   :  { %v3791_v28 = vmul.f32 %v5923_v14, %v3752_v59 }
0x1e16   :  { %v4684_v38 = vpop.f32.mrb[58].mxu1 }
0x1e17   :  { %v3794_v29 = vmul.f32 %v5944_v1, %v4684_v38  ;;  %v3762_v15 = vpop.f32.mrb[59].mxu1 }
0x1e18   :  { %v3793_v43 = vmul.f32 %v5936_v48, %v3762_v15  ;;  %v3807_v48 = vld [vmem:[%s6077_s1 + $0x1d8] sm:$0xff] }
0x1e19   :  { %v3800_v31 = vadd.f32 %v3794_v29, %v3792_v8 }
0x1e1a   :  { %v3799_v44 = vadd.f32 %v3793_v43, %v3791_v28  ;;  %v4687_v46 = vpop.f32.mrb[60].mxu1 }
0x1e1b   :  { %v3796_v24 = vmul.f32 %v5958_v6, %v4687_v46  ;;  %v3772_v47 = vpop.f32.mrb[61].mxu1 }
0x1e1c   :  { %v3795_v27 = vmul.f32 %v5950_v62, %v3772_v47  ;;  %v3806_v62 = vld [vmem:[%s6077_s1 + $0x1d0] sm:$0xff] }
0x1e1d   :  { %v3802_v32 = vadd.f32 %v3800_v31, %v3796_v24 }
0x1e1e   :  { %v3801_v36 = vadd.f32 %v3799_v44, %v3795_v27  ;;  %v4690_v35 = vpop.f32.mrb[62].mxu1 }
0x1e1f   :  { %v3798_v40 = vmul.f32 %v5972_v34, %v4690_v35  ;;  %v3782_v30 = vpop.f32.mrb[63].mxu1 }
0x1e20   :  { %v3797_v1 = vmul.f32 %v5964_v5, %v3782_v30 }
0x1e21   :  { %v3804_v16 = vadd.f32 %v3802_v32, %v3798_v40 }
0x1e22   :  { %v3803_v14 = vadd.f32 %v3801_v36, %v3797_v1 }
0x1e24   :  { %4693 = vmatprep.mubr.msk.f32.mxu1 %vm51_vm1, %v3803_v14 }
0x1e25   :  { %4694 = vmatmul.mubr.msk.f32.vlgmr.msra.gmra.mrb[64].mxu1 %vm51_vm1, %v3804_v16 }
0x1e26   :  { %4702 = vmatpush3.msra.mxu1 %v5064_v23 }
0x1ef8   :  { %v4695_v6 = vpop.f32.mrb[64].mxu1 }
0x1ef9   :  { %v3886_v34 = vadd.f32 %v4695_v6, %v3807_v48  ;;  %v3880_v0 = vpop.f32.mrb[65].mxu1 }
0x1efa   :  { %v3881_v42 = vadd.f32 %v3880_v0, %v3806_v62 }
0x1efb   :  { %v3890_v2 = vadd.f32 %v3886_v34, %v5896_v53 }
0x1efc   :  { %v3889_v5 = vadd.f32 %v3881_v42, %v5893_v52 }
0x1efe   :  { %4698 = vmatprep.mubr.msk.f32.mxu0 %vm51_vm1, %v3889_v5 }
0x1eff   :  { %4699 = vmatmul.mubr.msk.f32.vlgmr.msra.gmra.mrb[66].mxu0 %vm51_vm1, %v3890_v2 }
0x1fd2   :  { %v4700_v54 = vpop.f32.mrb[66].mxu0 }
0x1fd3   :  { %v3972_v50 = vadd.f32 %v4700_v54, %v3893_v7  ;;  %v3966_v9 = vpop.f32.mrb[67].mxu0 }
0x1fd4   :  { %v3967_v11 = vadd.f32 %v3966_v9, %v3892_v33 }
0x1fd5   :  { %v3976_v52 = vadd.f32 %v3972_v50, %v3890_v2 }
0x1fd6   :  { %v3975_v4 = vadd.f32 %v3967_v11, %v3889_v5 }
0x1fd8   :  { %4703 = vmatprep.mubr.msk.f32.mxu1 %vm51_vm1, %v3975_v4 }
0x1fd9   :  { %4704 = vmatmul.mubr.msk.f32.vlgmr.msra.gmra.mrb[66].mxu1 %vm51_vm1, %v3976_v52 }
0x20ac   :  { %v4705_v53 = vpop.f32.mrb[66].mxu1 }
0x20ad   :  { %v4055_v41 = vadd.f32 %v5065_v10, %v4705_v53  ;;  %v4049_v49 = vpop.f32.mrb[67].mxu1 }
0x20ae   :  { %v4050_v18 = vadd.f32 %v5066_v56, %v4049_v49 }
0x20af   :  { %v4059_v45 = vsub.f32 0.0, %v4055_v41 }
0x20b0   :  { %v4058_v26 = vsub.f32 0.0, %v4050_v18 }
0x20b1   :  { %v4062_v37 = vmul.f32 1.442695, %v4059_v45 }
0x20b2   :  { %v4060_v55 = vmul.f32 1.442695, %v4058_v26 }
0x20b3   :  { %5020 = vpow2.f32 %v4062_v37 }
0x20b4   :  { %5022 = vpow2.f32 %v4060_v55 }
0x20bd   :  { %v5021_v61 = vpop.eup %5020 }
0x20be   :  { %v5023_v39 = vpop.eup %5022  ;;  %v4065_v3 = vadd.f32 1.0, %v5021_v61 }
0x20bf   :  { %v4064_v51 = vadd.f32 1.0, %v5023_v39 }
0x20c0   :  { %5024 = vrcp.f32 %v4065_v3 }
0x20c1   :  { %5026 = vrcp.f32 %v4064_v51 }
0x20ca   :  { %v5025_v20 = vpop.eup %5024 }
0x20cb   :  { %v5027_v25 = vpop.eup %5026  ;;  %4074 = vrot.lane.b32.xlu1 %v5025_v20, %s5070_s28 }
0x20cc   :  { %4072 = vrot.lane.b32.xlu0 %v5027_v25, %s5070_s28 }
0x213d   :  { %v4075_v57 = vpop.permute.xlu1 %4074 }
0x213e   :  { %v4079_v19 = vsel %vm39_vm0, %v5609_v12, %v4075_v57  ;;  %v4073_v17 = vpop.permute.xlu0 %4072 }
0x213f   :  { %4081 = vst.msk [vmem:[%s6079_s2 + $0x8] sm:$0xff] %vm51_vm1, %v4079_v19  ;;  %v4078_v21 = vsel %vm39_vm0, %v5611_v13, %v4073_v17 }
0x2140   :  { %4080 = vst.msk [vmem:[%s6079_s2] sm:$0xff] %vm51_vm1, %v4078_v21 }

</bundles_post_ra>
